<compile_context>
chip_gen: v6e
topology: v6e:2x2x1
jax: 0.10.0
libtpu: 0.0.40
codegen_flags: <defaults>
</compile_context>

<pallas_src>
import functools

import jax
import jax.numpy as jnp
from jax.experimental import pallas as pl
from jax.experimental.pallas import tpu as pltpu

EPS = 1e-5  # PyTorch InstanceNorm2d default


def _round_up(x, m):
    return ((x + m - 1) // m) * m


def _unet_up_kernel(x_ref, w_ref, col_ref, o_ref, acc_ref, *, H, W):
    # x_ref:   (1, C_in_pad, P)       f32   P = H*W flat input pixels
    # w_ref:   (16*TCO, C_in_pad)     bf16  row = (ki*4+kj)*TCO + co   (this C_out tile)
    # col_ref: (1, P)                 int32 b = p % W
    # o_ref:   (1, 2, 2, TCO, P)      f32   parity-planar output (r, s, co, a*W+b)
    # acc_ref: (16*TCO, P + 2*HALO)   f32   tap buffer with halo (halo stays
    #                                       uninitialized: every halo read is masked)
    TCO = o_ref.shape[3]
    P = o_ref.shape[4]
    HALO = (acc_ref.shape[1] - P) // 2

    # --- transposed conv as ONE MXU matmul, contracting over C_in only ----------
    # acc[(ki*4+kj)*TCO + co, a*W+b] = sum_ci w[ci, co, ki, kj] * x[ci, a, b]
    xb = x_ref[0].astype(jnp.bfloat16)            # cast in VMEM (VPU), not in HBM
    acc_ref[:, HALO:HALO + P] = jnp.dot(
        w_ref[...], xb, preferred_element_type=jnp.float32)

    # Boundary masks, hoisted (computed once per grid step).
    pos = jax.lax.broadcasted_iota(jnp.int32, (1, P), 1)   # flat output-base index
    col = col_ref[...]                                     # b = pos % W
    row_mask = {-1: pos >= W, 0: None, 1: pos < (H - 1) * W}
    col_mask = {-1: col >= 1, 0: None, 1: col < (W - 1)}

    # Overlap-add (col2im) terms for k=4, s=2, p=1:
    #   out[co, 2a+r, 2b+s] = sum_{(ki,da) in row_terms[r], (kj,db) in col_terms[s]}
    #                         acc_block(ki,kj)[co, (a+da)*W + (b+db)]   (0 if OOB)
    row_terms = {0: ((1, 0), (3, -1)), 1: ((0, 1), (2, 0))}
    col_terms = {0: ((1, 0), (3, -1)), 1: ((0, 1), (2, 0))}

    def tap(ki, kj, da, db):
        row0 = (ki * 4 + kj) * TCO
        d = da * W + db                                     # static flat shift, |d| <= W+1
        blk = acc_ref[row0:row0 + TCO, HALO + d:HALO + d + P]   # (TCO, P)
        m = None
        for mm in (row_mask[da], col_mask[db]):
            if mm is not None:
                m = mm if m is None else jnp.logical_and(m, mm)
        if m is not None:
            blk = jnp.where(m, blk, 0.0)
        return blk

    # --- pass 1: overlap-add each parity plane, stage RAW into o_ref (VMEM) and
    #             accumulate one-pass InstanceNorm stats (sum, sum of squares) -----
    s1 = jnp.zeros((TCO, 1), jnp.float32)
    s2 = jnp.zeros((TCO, 1), jnp.float32)
    for r in (0, 1):
        for s in (0, 1):
            y = None
            for ki, da in row_terms[r]:
                for kj, db in col_terms[s]:
                    t = tap(ki, kj, da, db)
                    y = t if y is None else y + t
            o_ref[0, r, s] = y                               # stage (stays in VMEM)
            s1 = s1 + jnp.sum(y, axis=1, keepdims=True)      # lane reduce -> XLU
            s2 = s2 + jnp.sum(y * y, axis=1, keepdims=True)

    # --- InstanceNorm2d (affine=False, biased variance, eps=1e-5) + ReLU --------
    cnt = 4.0 * P                                            # full 2H x 2W extent
    mean = s1 / cnt
    var = jnp.maximum(s2 / cnt - mean * mean, 0.0)           # guard cancellation
    inv = jax.lax.rsqrt(var + EPS)

    # --- pass 2: normalize + ReLU in place (VMEM read-modify-write of o_ref) ----
    for r in (0, 1):
        for s in (0, 1):
            y = o_ref[0, r, s]
            o_ref[0, r, s] = jnp.maximum((y - mean) * inv, 0.0)


def unet_up(x, skip_input, weight, *, acc_budget_bytes=24 * 1024 * 1024):
    """UNetUp forward.

    x:          (N, C_in, H, W)        f32 NCHW
    skip_input: (N, C_skip, 2H, 2W)    f32
    weight:     (C_in, C_out, 4, 4)    f32 (PyTorch ConvTranspose2d layout)
    returns:    (N, C_out + C_skip, 2H, 2W) f32
    """
    N, C_in, H, W = x.shape
    C_out = weight.shape[1]
    P = H * W
    Ho, Wo = 2 * H, 2 * W
    HALO = W + 1                       # exactly what the shifted tap reads need

    # ---- C_out tile: largest divisor whose acc scratch fits (stats stay exact) ----
    def acc_bytes(tco):
        return 16 * tco * (P + 2 * HALO) * 4

    divisors = [d for d in range(1, C_out + 1) if C_out % d == 0]
    fitting = [d for d in divisors if acc_bytes(d) <= acc_budget_bytes] or [1]
    preferred = [d for d in fitting if d % 8 == 0 or d == C_out]
    TCO = max(preferred) if preferred else max(fitting)
    T = C_out // TCO

    # Contraction dim padded for full MXU K occupancy; zero rows are neutral.
    C_in_pad = _round_up(C_in, 128)

    # weight (C_in, C_out, 4, 4) -> (T*16*TCO, C_in_pad), rows grouped per C_out
    # tile; inside a tile: row = (ki*4+kj)*TCO + co_local (matches the kernel taps).
    w3 = jnp.transpose(weight, (2, 3, 1, 0)).reshape(16, C_out, C_in)
    w3 = jnp.pad(w3, ((0, 0), (0, 0), (0, C_in_pad - C_in)))
    w2 = (w3.reshape(16, T, TCO, C_in_pad)
             .transpose(1, 0, 2, 3)
             .reshape(T * 16 * TCO, C_in_pad)
             .astype(jnp.bfloat16))

    # x stays f32 in HBM (pure reshape + channel pad); the kernel casts to bf16.
    xk = jnp.pad(x.reshape(N, C_in, P), ((0, 0), (0, C_in_pad - C_in), (0, 0)))

    # Precomputed column index b = p % W (avoids in-kernel integer mod).
    colv = jnp.tile(jnp.arange(W, dtype=jnp.int32), H).reshape(1, P)

    kernel = functools.partial(_unet_up_kernel, H=H, W=W)

    # VMEM budget: actual requirement (+25% headroom), not a fixed 32 MiB.
    need = (acc_bytes(TCO)
            + 2 * C_in_pad * P * 4           # x block (double buffered)
            + 2 * 16 * TCO * C_in_pad * 2    # weight block
            + 2 * P * 4                      # col block
            + 2 * 4 * TCO * P * 4)           # output block
    vmem_limit = int(min(max(32 * 1024 * 1024, int(need * 1.25)),
                         96 * 1024 * 1024))

    out = pl.pallas_call(
        kernel,
        out_shape=jax.ShapeDtypeStruct((N, 2, 2, C_out, P), jnp.float32),
        grid_spec=pltpu.PrefetchScalarGridSpec(
            num_scalar_prefetch=0,
            grid=(N, T),                      # T innermost: x/col never re-DMA'd per n
            in_specs=[
                pl.BlockSpec((1, C_in_pad, P), lambda n, t: (n, 0, 0)),
                pl.BlockSpec((16 * TCO, C_in_pad), lambda n, t: (t, 0)),
                pl.BlockSpec((1, P), lambda n, t: (0, 0)),
            ],
            out_specs=pl.BlockSpec((1, 2, 2, TCO, P),
                                   lambda n, t: (n, 0, 0, t, 0)),
            scratch_shapes=[pltpu.VMEM((16 * TCO, P + 2 * HALO), jnp.float32)],
        ),
        compiler_params=pltpu.CompilerParams(
            # batch and channel-tile axes are fully independent -> both TCs on v7x
            dimension_semantics=("parallel", "parallel"),
            vmem_limit_bytes=vmem_limit,
        ),
    )(xk, w2, colv)

    # Pixel-shuffle the parity-planar output back to NCHW and append the skip
    # connection (XLA-side data movement; see TODO at top of file).
    up = out.reshape(N, 2, 2, C_out, H, W)
    up = jnp.transpose(up, (0, 3, 4, 1, 5, 2)).reshape(N, C_out, Ho, Wo)
    return jnp.concatenate([up, skip_input], axis=1)


def _reference(x, skip_input, weight):
    # Pure-JAX reference of the PyTorch module, with the same bf16 rounding of the
    # matmul operands that the kernel uses.
    xb = x.astype(jnp.bfloat16).astype(jnp.float32)
    wb = weight.astype(jnp.bfloat16).astype(jnp.float32)
    # ConvTranspose2d(k=4, s=2, p=1) == conv(dilate(x, 2), flip(w^T), pad = k-1-p = 2)
    w_conv = jnp.flip(jnp.transpose(wb, (1, 0, 2, 3)), axis=(2, 3))
    y = jax.lax.conv_general_dilated(
        xb, w_conv, window_strides=(1, 1), padding=((2, 2), (2, 2)),
        lhs_dilation=(2, 2), rhs_dilation=(1, 1),
        dimension_numbers=("NCHW", "OIHW", "NCHW"),
        precision=jax.lax.Precision.HIGHEST)
    mean = jnp.mean(y, axis=(2, 3), keepdims=True)
    var = jnp.mean((y - mean) ** 2, axis=(2, 3), keepdims=True)
    y = jnp.maximum((y - mean) * jax.lax.rsqrt(var + EPS), 0.0)
    return jnp.concatenate([y, skip_input], axis=1)


if __name__ == "__main__":
    key = jax.random.PRNGKey(0)
    kx, ks, kw = jax.random.split(key, 3)

    N, C_in, H, W = 2, 4, 16, 16
    C_out, C_skip = 8, 8

    x = jax.random.normal(kx, (N, C_in, H, W), dtype=jnp.float32)
    skip_input = jax.random.normal(ks, (N, C_skip, 2 * H, 2 * W), dtype=jnp.float32)
    weight = jax.random.normal(kw, (C_in, C_out, 4, 4), dtype=jnp.float32) / jnp.sqrt(
        float(C_in * 16))

    out = unet_up(x, skip_input, weight)
    jax.block_until_ready(out)
    assert out.shape == (N, C_out + C_skip, 2 * H, 2 * W), out.shape

    ref = _reference(x, skip_input, weight)
    err = float(jnp.max(jnp.abs(out - ref)))
    assert err < 2e-2, f"max abs err vs reference = {err}"

    print("KERNEL_OK")
</pallas_src>

<mosaic_0001>
module attributes {stable_mosaic.version = 11 : i64} {
  func.func @_unet_up_kernel(%arg0: i32, %arg1: i32, %arg2: memref<1x128x256xf32, #tpu.memory_space<vmem>>, %arg3: memref<128x128xbf16, #tpu.memory_space<vmem>>, %arg4: memref<1x256xi32, #tpu.memory_space<vmem>>, %arg5: memref<1x2x2x8x256xf32, #tpu.memory_space<vmem>>, %arg6: memref<128x290xf32, #tpu.memory_space<vmem>>) attributes {dimension_semantics = [#tpu.dimension_semantics<parallel>, #tpu.dimension_semantics<parallel>], iteration_bounds = array<i64: 2, 1>, scalar_prefetch = 0 : i64, scratch_operands = 1 : i64, tpu.core_type = #tpu.core_type<tc>, window_params = [{transform_indices = @transform_0, window_bounds = array<i64: 1, 128, 256>}, {transform_indices = @transform_1, window_bounds = array<i64: 128, 128>}, {pipeline_mode = #tpu.pipeline_mode<synchronous>, transform_indices = @transform_2, window_bounds = array<i64: 1, 256>}, {transform_indices = @transform_3, window_bounds = array<i64: 1, 2, 2, 8, 256>}]} {
    %c0 = arith.constant 0 : index
    %c0_0 = arith.constant 0 : index
    %c0_1 = arith.constant 0 : index
    %0 = vector.load %arg2[%c0, %c0_0, %c0_1] : memref<1x128x256xf32, #tpu.memory_space<vmem>>, vector<1x128x256xf32>
    %1 = vector.shape_cast %0 : vector<1x128x256xf32> to vector<128x256xf32>
    %2 = arith.truncf %1 : vector<128x256xf32> to vector<128x256xbf16>
    %c0_2 = arith.constant 0 : index
    %c0_3 = arith.constant 0 : index
    %3 = vector.load %arg3[%c0_2, %c0_3] : memref<128x128xbf16, #tpu.memory_space<vmem>>, vector<128x128xbf16>
    %cst = arith.constant dense<0.000000e+00> : vector<128x256xf32>
    %4 = tpu.matmul %3, %2, %cst {dimension_numbers = #tpu.dot_dimension_numbers<[1], [0], [0], [1], [0, 0, 1, 1], [], []>} : vector<128x128xbf16>, vector<128x256xbf16>, vector<128x256xf32> -> vector<128x256xf32>
    %c0_4 = arith.constant 0 : index
    %c17 = arith.constant 17 : index
    %5 = vector.load %arg6[%c0_4, %c17] : memref<128x290xf32, #tpu.memory_space<vmem>>, vector<128x256xf32>
    tpu.vector_store %arg6[%c0_4, %c17], %4 {strides = array<i32>} : memref<128x290xf32, #tpu.memory_space<vmem>>, vector<128x256xf32>,
    %6 = tpu.iota {dimensions = array<i32: 1>} : vector<1x256xi32>
    %c0_5 = arith.constant 0 : index
    %c0_6 = arith.constant 0 : index
    %7 = vector.load %arg4[%c0_5, %c0_6] : memref<1x256xi32, #tpu.memory_space<vmem>>, vector<1x256xi32>
    %c16_i32 = arith.constant 16 : i32
    %8 = vector.broadcast %c16_i32 : i32 to vector<1x256xi32>
    %9 = arith.cmpi sge, %6, %8 : vector<1x256xi32>
    %c240_i32 = arith.constant 240 : i32
    %10 = vector.broadcast %c240_i32 : i32 to vector<1x256xi32>
    %11 = arith.cmpi slt, %6, %10 : vector<1x256xi32>
    %c1_i32 = arith.constant 1 : i32
    %12 = vector.broadcast %c1_i32 : i32 to vector<1x256xi32>
    %13 = arith.cmpi sge, %7, %12 : vector<1x256xi32>
    %c15_i32 = arith.constant 15 : i32
    %14 = vector.broadcast %c15_i32 : i32 to vector<1x256xi32>
    %15 = arith.cmpi slt, %7, %14 : vector<1x256xi32>
    %cst_7 = arith.constant 0.000000e+00 : f32
    %16 = vector.broadcast %cst_7 : f32 to vector<8x1xf32>
    %cst_8 = arith.constant 0.000000e+00 : f32
    %17 = vector.broadcast %cst_8 : f32 to vector<8x1xf32>
    %c40 = arith.constant 40 : index
    %c17_9 = arith.constant 17 : index
    %18 = vector.load %arg6[%c40, %c17_9] : memref<128x290xf32, #tpu.memory_space<vmem>>, vector<8x256xf32>
    %c56 = arith.constant 56 : index
    %c16 = arith.constant 16 : index
    %19 = vector.load %arg6[%c56, %c16] : memref<128x290xf32, #tpu.memory_space<vmem>>, vector<8x256xf32>
    %cst_10 = arith.constant 0.000000e+00 : f32
    %20 = vector.shape_cast %13 : vector<1x256xi1> to vector<1x256xi1>
    %21 = vector.broadcast %20 : vector<1x256xi1> to vector<8x256xi1>
    %22 = vector.broadcast %cst_10 : f32 to vector<8x256xf32>
    %23 = arith.select %21, %19, %22 : vector<8x256xi1>, vector<8x256xf32>
    %24 = arith.addf %18, %23 : vector<8x256xf32>
    %c104 = arith.constant 104 : index
    %c1 = arith.constant 1 : index
    %25 = vector.load %arg6[%c104, %c1] : memref<128x290xf32, #tpu.memory_space<vmem>>, vector<8x256xf32>
    %cst_11 = arith.constant 0.000000e+00 : f32
    %26 = vector.shape_cast %9 : vector<1x256xi1> to vector<1x256xi1>
    %27 = vector.broadcast %26 : vector<1x256xi1> to vector<8x256xi1>
    %28 = vector.broadcast %cst_11 : f32 to vector<8x256xf32>
    %29 = arith.select %27, %25, %28 : vector<8x256xi1>, vector<8x256xf32>
    %30 = arith.addf %24, %29 : vector<8x256xf32>
    %c120 = arith.constant 120 : index
    %c0_12 = arith.constant 0 : index
    %31 = vector.load %arg6[%c120, %c0_12] : memref<128x290xf32, #tpu.memory_space<vmem>>, vector<8x256xf32>
    %32 = arith.andi %9, %13 : vector<1x256xi1>
    %cst_13 = arith.constant 0.000000e+00 : f32
    %33 = vector.shape_cast %32 : vector<1x256xi1> to vector<1x256xi1>
    %34 = vector.broadcast %33 : vector<1x256xi1> to vector<8x256xi1>
    %35 = vector.broadcast %cst_13 : f32 to vector<8x256xf32>
    %36 = arith.select %34, %31, %35 : vector<8x256xi1>, vector<8x256xf32>
    %37 = arith.addf %30, %36 : vector<8x256xf32>
    %c0_14 = arith.constant 0 : index
    %c0_15 = arith.constant 0 : index
    %c0_16 = arith.constant 0 : index
    %c0_17 = arith.constant 0 : index
    %c0_18 = arith.constant 0 : index
    %38 = vector.load %arg5[%c0_14, %c0_15, %c0_16, %c0_17, %c0_18] : memref<1x2x2x8x256xf32, #tpu.memory_space<vmem>>, vector<1x1x1x8x256xf32>
    %39 = vector.shape_cast %38 : vector<1x1x1x8x256xf32> to vector<8x256xf32>
    %40 = vector.shape_cast %37 : vector<8x256xf32> to vector<1x1x1x8x256xf32>
    tpu.vector_store %arg5[%c0_14, %c0_15, %c0_16, %c0_17, %c0_18], %40 {strides = array<i32>} : memref<1x2x2x8x256xf32, #tpu.memory_space<vmem>>, vector<1x1x1x8x256xf32>,
    %cst_19 = arith.constant dense<0.000000e+00> : vector<8xf32>
    %41 = vector.multi_reduction <add>, %37, %cst_19 [1] : vector<8x256xf32> to vector<8xf32>
    %42 = vector.shape_cast %41 : vector<8xf32> to vector<8x1xf32>
    %43 = arith.addf %16, %42 : vector<8x1xf32>
    %44 = arith.mulf %37, %37 : vector<8x256xf32>
    %cst_20 = arith.constant dense<0.000000e+00> : vector<8xf32>
    %45 = vector.multi_reduction <add>, %44, %cst_20 [1] : vector<8x256xf32> to vector<8xf32>
    %46 = vector.shape_cast %45 : vector<8xf32> to vector<8x1xf32>
    %47 = arith.addf %17, %46 : vector<8x1xf32>
    %c32 = arith.constant 32 : index
    %c18 = arith.constant 18 : index
    %48 = vector.load %arg6[%c32, %c18] : memref<128x290xf32, #tpu.memory_space<vmem>>, vector<8x256xf32>
    %cst_21 = arith.constant 0.000000e+00 : f32
    %49 = vector.shape_cast %15 : vector<1x256xi1> to vector<1x256xi1>
    %50 = vector.broadcast %49 : vector<1x256xi1> to vector<8x256xi1>
    %51 = vector.broadcast %cst_21 : f32 to vector<8x256xf32>
    %52 = arith.select %50, %48, %51 : vector<8x256xi1>, vector<8x256xf32>
    %c48 = arith.constant 48 : index
    %c17_22 = arith.constant 17 : index
    %53 = vector.load %arg6[%c48, %c17_22] : memref<128x290xf32, #tpu.memory_space<vmem>>, vector<8x256xf32>
    %54 = arith.addf %52, %53 : vector<8x256xf32>
    %c96 = arith.constant 96 : index
    %c2 = arith.constant 2 : index
    %55 = vector.load %arg6[%c96, %c2] : memref<128x290xf32, #tpu.memory_space<vmem>>, vector<8x256xf32>
    %56 = arith.andi %9, %15 : vector<1x256xi1>
    %cst_23 = arith.constant 0.000000e+00 : f32
    %57 = vector.shape_cast %56 : vector<1x256xi1> to vector<1x256xi1>
    %58 = vector.broadcast %57 : vector<1x256xi1> to vector<8x256xi1>
    %59 = vector.broadcast %cst_23 : f32 to vector<8x256xf32>
    %60 = arith.select %58, %55, %59 : vector<8x256xi1>, vector<8x256xf32>
    %61 = arith.addf %54, %60 : vector<8x256xf32>
    %c112 = arith.constant 112 : index
    %c1_24 = arith.constant 1 : index
    %62 = vector.load %arg6[%c112, %c1_24] : memref<128x290xf32, #tpu.memory_space<vmem>>, vector<8x256xf32>
    %cst_25 = arith.constant 0.000000e+00 : f32
    %63 = vector.shape_cast %9 : vector<1x256xi1> to vector<1x256xi1>
    %64 = vector.broadcast %63 : vector<1x256xi1> to vector<8x256xi1>
    %65 = vector.broadcast %cst_25 : f32 to vector<8x256xf32>
    %66 = arith.select %64, %62, %65 : vector<8x256xi1>, vector<8x256xf32>
    %67 = arith.addf %61, %66 : vector<8x256xf32>
    %c0_26 = arith.constant 0 : index
    %c0_27 = arith.constant 0 : index
    %c1_28 = arith.constant 1 : index
    %c0_29 = arith.constant 0 : index
    %c0_30 = arith.constant 0 : index
    %68 = vector.load %arg5[%c0_26, %c0_27, %c1_28, %c0_29, %c0_30] : memref<1x2x2x8x256xf32, #tpu.memory_space<vmem>>, vector<1x1x1x8x256xf32>
    %69 = vector.shape_cast %68 : vector<1x1x1x8x256xf32> to vector<8x256xf32>
    %70 = vector.shape_cast %67 : vector<8x256xf32> to vector<1x1x1x8x256xf32>
    tpu.vector_store %arg5[%c0_26, %c0_27, %c1_28, %c0_29, %c0_30], %70 {strides = array<i32>} : memref<1x2x2x8x256xf32, #tpu.memory_space<vmem>>, vector<1x1x1x8x256xf32>,
    %cst_31 = arith.constant dense<0.000000e+00> : vector<8xf32>
    %71 = vector.multi_reduction <add>, %67, %cst_31 [1] : vector<8x256xf32> to vector<8xf32>
    %72 = vector.shape_cast %71 : vector<8xf32> to vector<8x1xf32>
    %73 = arith.addf %43, %72 : vector<8x1xf32>
    %74 = arith.mulf %67, %67 : vector<8x256xf32>
    %cst_32 = arith.constant dense<0.000000e+00> : vector<8xf32>
    %75 = vector.multi_reduction <add>, %74, %cst_32 [1] : vector<8x256xf32> to vector<8xf32>
    %76 = vector.shape_cast %75 : vector<8xf32> to vector<8x1xf32>
    %77 = arith.addf %47, %76 : vector<8x1xf32>
    %c8 = arith.constant 8 : index
    %c33 = arith.constant 33 : index
    %78 = vector.load %arg6[%c8, %c33] : memref<128x290xf32, #tpu.memory_space<vmem>>, vector<8x256xf32>
    %cst_33 = arith.constant 0.000000e+00 : f32
    %79 = vector.shape_cast %11 : vector<1x256xi1> to vector<1x256xi1>
    %80 = vector.broadcast %79 : vector<1x256xi1> to vector<8x256xi1>
    %81 = vector.broadcast %cst_33 : f32 to vector<8x256xf32>
    %82 = arith.select %80, %78, %81 : vector<8x256xi1>, vector<8x256xf32>
    %c24 = arith.constant 24 : index
    %c32_34 = arith.constant 32 : index
    %83 = vector.load %arg6[%c24, %c32_34] : memref<128x290xf32, #tpu.memory_space<vmem>>, vector<8x256xf32>
    %84 = arith.andi %11, %13 : vector<1x256xi1>
    %cst_35 = arith.constant 0.000000e+00 : f32
    %85 = vector.shape_cast %84 : vector<1x256xi1> to vector<1x256xi1>
    %86 = vector.broadcast %85 : vector<1x256xi1> to vector<8x256xi1>
    %87 = vector.broadcast %cst_35 : f32 to vector<8x256xf32>
    %88 = arith.select %86, %83, %87 : vector<8x256xi1>, vector<8x256xf32>
    %89 = arith.addf %82, %88 : vector<8x256xf32>
    %c72 = arith.constant 72 : index
    %c17_36 = arith.constant 17 : index
    %90 = vector.load %arg6[%c72, %c17_36] : memref<128x290xf32, #tpu.memory_space<vmem>>, vector<8x256xf32>
    %91 = arith.addf %89, %90 : vector<8x256xf32>
    %c88 = arith.constant 88 : index
    %c16_37 = arith.constant 16 : index
    %92 = vector.load %arg6[%c88, %c16_37] : memref<128x290xf32, #tpu.memory_space<vmem>>, vector<8x256xf32>
    %cst_38 = arith.constant 0.000000e+00 : f32
    %93 = vector.shape_cast %13 : vector<1x256xi1> to vector<1x256xi1>
    %94 = vector.broadcast %93 : vector<1x256xi1> to vector<8x256xi1>
    %95 = vector.broadcast %cst_38 : f32 to vector<8x256xf32>
    %96 = arith.select %94, %92, %95 : vector<8x256xi1>, vector<8x256xf32>
    %97 = arith.addf %91, %96 : vector<8x256xf32>
    %c0_39 = arith.constant 0 : index
    %c1_40 = arith.constant 1 : index
    %c0_41 = arith.constant 0 : index
    %c0_42 = arith.constant 0 : index
    %c0_43 = arith.constant 0 : index
    %98 = vector.load %arg5[%c0_39, %c1_40, %c0_41, %c0_42, %c0_43] : memref<1x2x2x8x256xf32, #tpu.memory_space<vmem>>, vector<1x1x1x8x256xf32>
    %99 = vector.shape_cast %98 : vector<1x1x1x8x256xf32> to vector<8x256xf32>
    %100 = vector.shape_cast %97 : vector<8x256xf32> to vector<1x1x1x8x256xf32>
    tpu.vector_store %arg5[%c0_39, %c1_40, %c0_41, %c0_42, %c0_43], %100 {strides = array<i32>} : memref<1x2x2x8x256xf32, #tpu.memory_space<vmem>>, vector<1x1x1x8x256xf32>,
    %cst_44 = arith.constant dense<0.000000e+00> : vector<8xf32>
    %101 = vector.multi_reduction <add>, %97, %cst_44 [1] : vector<8x256xf32> to vector<8xf32>
    %102 = vector.shape_cast %101 : vector<8xf32> to vector<8x1xf32>
    %103 = arith.addf %73, %102 : vector<8x1xf32>
    %104 = arith.mulf %97, %97 : vector<8x256xf32>
    %cst_45 = arith.constant dense<0.000000e+00> : vector<8xf32>
    %105 = vector.multi_reduction <add>, %104, %cst_45 [1] : vector<8x256xf32> to vector<8xf32>
    %106 = vector.shape_cast %105 : vector<8xf32> to vector<8x1xf32>
    %107 = arith.addf %77, %106 : vector<8x1xf32>
    %c0_46 = arith.constant 0 : index
    %c34 = arith.constant 34 : index
    %108 = vector.load %arg6[%c0_46, %c34] : memref<128x290xf32, #tpu.memory_space<vmem>>, vector<8x256xf32>
    %109 = arith.andi %11, %15 : vector<1x256xi1>
    %cst_47 = arith.constant 0.000000e+00 : f32
    %110 = vector.shape_cast %109 : vector<1x256xi1> to vector<1x256xi1>
    %111 = vector.broadcast %110 : vector<1x256xi1> to vector<8x256xi1>
    %112 = vector.broadcast %cst_47 : f32 to vector<8x256xf32>
    %113 = arith.select %111, %108, %112 : vector<8x256xi1>, vector<8x256xf32>
    %c16_48 = arith.constant 16 : index
    %c33_49 = arith.constant 33 : index
    %114 = vector.load %arg6[%c16_48, %c33_49] : memref<128x290xf32, #tpu.memory_space<vmem>>, vector<8x256xf32>
    %cst_50 = arith.constant 0.000000e+00 : f32
    %115 = vector.shape_cast %11 : vector<1x256xi1> to vector<1x256xi1>
    %116 = vector.broadcast %115 : vector<1x256xi1> to vector<8x256xi1>
    %117 = vector.broadcast %cst_50 : f32 to vector<8x256xf32>
    %118 = arith.select %116, %114, %117 : vector<8x256xi1>, vector<8x256xf32>
    %119 = arith.addf %113, %118 : vector<8x256xf32>
    %c64 = arith.constant 64 : index
    %c18_51 = arith.constant 18 : index
    %120 = vector.load %arg6[%c64, %c18_51] : memref<128x290xf32, #tpu.memory_space<vmem>>, vector<8x256xf32>
    %cst_52 = arith.constant 0.000000e+00 : f32
    %121 = vector.shape_cast %15 : vector<1x256xi1> to vector<1x256xi1>
    %122 = vector.broadcast %121 : vector<1x256xi1> to vector<8x256xi1>
    %123 = vector.broadcast %cst_52 : f32 to vector<8x256xf32>
    %124 = arith.select %122, %120, %123 : vector<8x256xi1>, vector<8x256xf32>
    %125 = arith.addf %119, %124 : vector<8x256xf32>
    %c80 = arith.constant 80 : index
    %c17_53 = arith.constant 17 : index
    %126 = vector.load %arg6[%c80, %c17_53] : memref<128x290xf32, #tpu.memory_space<vmem>>, vector<8x256xf32>
    %127 = arith.addf %125, %126 : vector<8x256xf32>
    %c0_54 = arith.constant 0 : index
    %c1_55 = arith.constant 1 : index
    %c1_56 = arith.constant 1 : index
    %c0_57 = arith.constant 0 : index
    %c0_58 = arith.constant 0 : index
    %128 = vector.load %arg5[%c0_54, %c1_55, %c1_56, %c0_57, %c0_58] : memref<1x2x2x8x256xf32, #tpu.memory_space<vmem>>, vector<1x1x1x8x256xf32>
    %129 = vector.shape_cast %128 : vector<1x1x1x8x256xf32> to vector<8x256xf32>
    %130 = vector.shape_cast %127 : vector<8x256xf32> to vector<1x1x1x8x256xf32>
    tpu.vector_store %arg5[%c0_54, %c1_55, %c1_56, %c0_57, %c0_58], %130 {strides = array<i32>} : memref<1x2x2x8x256xf32, #tpu.memory_space<vmem>>, vector<1x1x1x8x256xf32>,
    %cst_59 = arith.constant dense<0.000000e+00> : vector<8xf32>
    %131 = vector.multi_reduction <add>, %127, %cst_59 [1] : vector<8x256xf32> to vector<8xf32>
    %132 = vector.shape_cast %131 : vector<8xf32> to vector<8x1xf32>
    %133 = arith.addf %103, %132 : vector<8x1xf32>
    %134 = arith.mulf %127, %127 : vector<8x256xf32>
    %cst_60 = arith.constant dense<0.000000e+00> : vector<8xf32>
    %135 = vector.multi_reduction <add>, %134, %cst_60 [1] : vector<8x256xf32> to vector<8xf32>
    %136 = vector.shape_cast %135 : vector<8xf32> to vector<8x1xf32>
    %137 = arith.addf %107, %136 : vector<8x1xf32>
    %cst_61 = arith.constant 1.024000e+03 : f32
    %138 = vector.broadcast %cst_61 : f32 to vector<8x1xf32>
    %139 = arith.divf %133, %138 : vector<8x1xf32>
    %cst_62 = arith.constant 1.024000e+03 : f32
    %140 = vector.broadcast %cst_62 : f32 to vector<8x1xf32>
    %141 = arith.divf %137, %140 : vector<8x1xf32>
    %142 = arith.mulf %139, %139 : vector<8x1xf32>
    %143 = arith.subf %141, %142 : vector<8x1xf32>
    %cst_63 = arith.constant 0.000000e+00 : f32
    %144 = vector.broadcast %cst_63 : f32 to vector<8x1xf32>
    %145 = arith.maximumf %143, %144 : vector<8x1xf32>
    %cst_64 = arith.constant 9.99999974E-6 : f32
    %146 = vector.broadcast %cst_64 : f32 to vector<8x1xf32>
    %147 = arith.addf %145, %146 : vector<8x1xf32>
    %148 = math.rsqrt %147 : vector<8x1xf32>
    %c0_65 = arith.constant 0 : index
    %c0_66 = arith.constant 0 : index
    %c0_67 = arith.constant 0 : index
    %c0_68 = arith.constant 0 : index
    %c0_69 = arith.constant 0 : index
    %149 = vector.load %arg5[%c0_65, %c0_66, %c0_67, %c0_68, %c0_69] : memref<1x2x2x8x256xf32, #tpu.memory_space<vmem>>, vector<1x1x1x8x256xf32>
    %150 = vector.shape_cast %149 : vector<1x1x1x8x256xf32> to vector<8x256xf32>
    %151 = vector.broadcast %139 : vector<8x1xf32> to vector<8x256xf32>
    %152 = arith.subf %150, %151 : vector<8x256xf32>
    %153 = vector.broadcast %148 : vector<8x1xf32> to vector<8x256xf32>
    %154 = arith.mulf %152, %153 : vector<8x256xf32>
    %cst_70 = arith.constant 0.000000e+00 : f32
    %155 = vector.broadcast %cst_70 : f32 to vector<8x256xf32>
    %156 = arith.maximumf %154, %155 : vector<8x256xf32>
    %c0_71 = arith.constant 0 : index
    %c0_72 = arith.constant 0 : index
    %c0_73 = arith.constant 0 : index
    %c0_74 = arith.constant 0 : index
    %c0_75 = arith.constant 0 : index
    %157 = vector.load %arg5[%c0_71, %c0_72, %c0_73, %c0_74, %c0_75] : memref<1x2x2x8x256xf32, #tpu.memory_space<vmem>>, vector<1x1x1x8x256xf32>
    %158 = vector.shape_cast %157 : vector<1x1x1x8x256xf32> to vector<8x256xf32>
    %159 = vector.shape_cast %156 : vector<8x256xf32> to vector<1x1x1x8x256xf32>
    tpu.vector_store %arg5[%c0_71, %c0_72, %c0_73, %c0_74, %c0_75], %159 {strides = array<i32>} : memref<1x2x2x8x256xf32, #tpu.memory_space<vmem>>, vector<1x1x1x8x256xf32>,
    %c0_76 = arith.constant 0 : index
    %c0_77 = arith.constant 0 : index
    %c1_78 = arith.constant 1 : index
    %c0_79 = arith.constant 0 : index
    %c0_80 = arith.constant 0 : index
    %160 = vector.load %arg5[%c0_76, %c0_77, %c1_78, %c0_79, %c0_80] : memref<1x2x2x8x256xf32, #tpu.memory_space<vmem>>, vector<1x1x1x8x256xf32>
    %161 = vector.shape_cast %160 : vector<1x1x1x8x256xf32> to vector<8x256xf32>
    %162 = vector.broadcast %139 : vector<8x1xf32> to vector<8x256xf32>
    %163 = arith.subf %161, %162 : vector<8x256xf32>
    %164 = vector.broadcast %148 : vector<8x1xf32> to vector<8x256xf32>
    %165 = arith.mulf %163, %164 : vector<8x256xf32>
    %cst_81 = arith.constant 0.000000e+00 : f32
    %166 = vector.broadcast %cst_81 : f32 to vector<8x256xf32>
    %167 = arith.maximumf %165, %166 : vector<8x256xf32>
    %c0_82 = arith.constant 0 : index
    %c0_83 = arith.constant 0 : index
    %c1_84 = arith.constant 1 : index
    %c0_85 = arith.constant 0 : index
    %c0_86 = arith.constant 0 : index
    %168 = vector.load %arg5[%c0_82, %c0_83, %c1_84, %c0_85, %c0_86] : memref<1x2x2x8x256xf32, #tpu.memory_space<vmem>>, vector<1x1x1x8x256xf32>
    %169 = vector.shape_cast %168 : vector<1x1x1x8x256xf32> to vector<8x256xf32>
    %170 = vector.shape_cast %167 : vector<8x256xf32> to vector<1x1x1x8x256xf32>
    tpu.vector_store %arg5[%c0_82, %c0_83, %c1_84, %c0_85, %c0_86], %170 {strides = array<i32>} : memref<1x2x2x8x256xf32, #tpu.memory_space<vmem>>, vector<1x1x1x8x256xf32>,
    %c0_87 = arith.constant 0 : index
    %c1_88 = arith.constant 1 : index
    %c0_89 = arith.constant 0 : index
    %c0_90 = arith.constant 0 : index
    %c0_91 = arith.constant 0 : index
    %171 = vector.load %arg5[%c0_87, %c1_88, %c0_89, %c0_90, %c0_91] : memref<1x2x2x8x256xf32, #tpu.memory_space<vmem>>, vector<1x1x1x8x256xf32>
    %172 = vector.shape_cast %171 : vector<1x1x1x8x256xf32> to vector<8x256xf32>
    %173 = vector.broadcast %139 : vector<8x1xf32> to vector<8x256xf32>
    %174 = arith.subf %172, %173 : vector<8x256xf32>
    %175 = vector.broadcast %148 : vector<8x1xf32> to vector<8x256xf32>
    %176 = arith.mulf %174, %175 : vector<8x256xf32>
    %cst_92 = arith.constant 0.000000e+00 : f32
    %177 = vector.broadcast %cst_92 : f32 to vector<8x256xf32>
    %178 = arith.maximumf %176, %177 : vector<8x256xf32>
    %c0_93 = arith.constant 0 : index
    %c1_94 = arith.constant 1 : index
    %c0_95 = arith.constant 0 : index
    %c0_96 = arith.constant 0 : index
    %c0_97 = arith.constant 0 : index
    %179 = vector.load %arg5[%c0_93, %c1_94, %c0_95, %c0_96, %c0_97] : memref<1x2x2x8x256xf32, #tpu.memory_space<vmem>>, vector<1x1x1x8x256xf32>
    %180 = vector.shape_cast %179 : vector<1x1x1x8x256xf32> to vector<8x256xf32>
    %181 = vector.shape_cast %178 : vector<8x256xf32> to vector<1x1x1x8x256xf32>
    tpu.vector_store %arg5[%c0_93, %c1_94, %c0_95, %c0_96, %c0_97], %181 {strides = array<i32>} : memref<1x2x2x8x256xf32, #tpu.memory_space<vmem>>, vector<1x1x1x8x256xf32>,
    %c0_98 = arith.constant 0 : index
    %c1_99 = arith.constant 1 : index
    %c1_100 = arith.constant 1 : index
    %c0_101 = arith.constant 0 : index
    %c0_102 = arith.constant 0 : index
    %182 = vector.load %arg5[%c0_98, %c1_99, %c1_100, %c0_101, %c0_102] : memref<1x2x2x8x256xf32, #tpu.memory_space<vmem>>, vector<1x1x1x8x256xf32>
    %183 = vector.shape_cast %182 : vector<1x1x1x8x256xf32> to vector<8x256xf32>
    %184 = vector.broadcast %139 : vector<8x1xf32> to vector<8x256xf32>
    %185 = arith.subf %183, %184 : vector<8x256xf32>
    %186 = vector.broadcast %148 : vector<8x1xf32> to vector<8x256xf32>
    %187 = arith.mulf %185, %186 : vector<8x256xf32>
    %cst_103 = arith.constant 0.000000e+00 : f32
    %188 = vector.broadcast %cst_103 : f32 to vector<8x256xf32>
    %189 = arith.maximumf %187, %188 : vector<8x256xf32>
    %c0_104 = arith.constant 0 : index
    %c1_105 = arith.constant 1 : index
    %c1_106 = arith.constant 1 : index
    %c0_107 = arith.constant 0 : index
    %c0_108 = arith.constant 0 : index
    %190 = vector.load %arg5[%c0_104, %c1_105, %c1_106, %c0_107, %c0_108] : memref<1x2x2x8x256xf32, #tpu.memory_space<vmem>>, vector<1x1x1x8x256xf32>
    %191 = vector.shape_cast %190 : vector<1x1x1x8x256xf32> to vector<8x256xf32>
    %192 = vector.shape_cast %189 : vector<8x256xf32> to vector<1x1x1x8x256xf32>
    tpu.vector_store %arg5[%c0_104, %c1_105, %c1_106, %c0_107, %c0_108], %192 {strides = array<i32>} : memref<1x2x2x8x256xf32, #tpu.memory_space<vmem>>, vector<1x1x1x8x256xf32>,
    return
  }
  func.func @transform_0(%arg0: i32, %arg1: i32) -> (i32, i32, i32) {
    %c0_i32 = arith.constant 0 : i32
    %c0_i32_0 = arith.constant 0 : i32
    %c0_i32_1 = arith.constant 0 : i32
    return %arg0, %c0_i32, %c0_i32_0 : i32, i32, i32
  }
  func.func @transform_1(%arg0: i32, %arg1: i32) -> (i32, i32) {
    %c0_i32 = arith.constant 0 : i32
    %c0_i32_0 = arith.constant 0 : i32
    return %arg1, %c0_i32 : i32, i32
  }
  func.func @transform_2(%arg0: i32, %arg1: i32) -> (i32, i32) {
    %c0_i32 = arith.constant 0 : i32
    %c0_i32_0 = arith.constant 0 : i32
    %c0_i32_1 = arith.constant 0 : i32
    return %c0_i32, %c0_i32_0 : i32, i32
  }
  func.func @transform_3(%arg0: i32, %arg1: i32) -> (i32, i32, i32, i32, i32) {
    %c0_i32 = arith.constant 0 : i32
    %c0_i32_0 = arith.constant 0 : i32
    %c0_i32_1 = arith.constant 0 : i32
    %c0_i32_2 = arith.constant 0 : i32
    return %arg0, %c0_i32, %c0_i32_0, %arg1, %c0_i32_1 : i32, i32, i32, i32, i32
  }
}

</mosaic_0001>

<bundles_post_ra>
// kernel: tpu_custom_call.1
= control target key start
LH: loop header
LB: loop body
LE: loop exit
PB: predicated region body
PF: predicated region fallthrough
CT: control target
= control target key end

     0   :  { %8 = vsyncpa [#allocation4], 0  ;;  %s2312_s0 = inlined_call_operand.hbm [shape: f32[2,128,256], index: 0, kind: input, shape index: {}]   ;;  %s2313_s1 = inlined_call_operand.hbm [shape: bf16[128,128], index: 1, kind: input, shape index: {}]   ;;  %s2314_s2 = inlined_call_operand.vmem [shape: s32[1,256], index: 2, kind: input, shape index: {}]   ;;  %s2315_s3 = inlined_call_operand.hbm [shape: f32[2,2,2,8,256], index: 3, kind: output, shape index: {}]  }
   0x1   :  { %10 = vsyncpa [#allocation4 + $0x1], 0 }
   0x2   :  { %11 = vsyncpa [#allocation7], 0 }
   0x3   :  { %12 = vsyncpa [#allocation5], 0 }
   0x4   :  { %14 = vsyncpa [#allocation5 + $0x1], 0  ;;  %s1658_s12 = smov 0   ;;  %s1660_s13 = smov 0  }
   0x5   :  { %s1662_s14 = smov 0   ;;  %s1664_s15 = smov 0  }
   0x6   :  { %s1666_s16 = smov 0   ;;  %s1668_s17 = smov 0  }
   0x7 LB: > { %s1319_s18 = sadd.s32 4294967295, %s1617_s17   ;;  %s1320_s19 = sadd.s32 4294967294, %s1617_s17   ;;  %s1617_s17 = sphi %s1668_s17, %s20_s17   ;;  %s1613_s16 = sphi %s1666_s16, %s2347_s16   ;;  %s1609_s15 = sphi %s1664_s15, %s2346_s15   ;;  %s1605_s14 = sphi %s1662_s14, %s2345_s14   ;;  %s1601_s13 = sphi %s1660_s13, %s2344_s13   ;;  %s1597_s12 = sphi %s1658_s12, %s2343_s12  }
   0x8   : > { %p52_p0 = scmp.ne.s32.totalorder %s1601_s13, %s1597_s12  ;;  %p1692_p1 = scmp.eq.s32.totalorder %s1319_s18, 0 }
   0x9   : > { %p1696_p2 = scmp.eq.s32.totalorder %s1319_s18, 1  ;;  %p131_p3 = scmp.eq.s32.totalorder %s1320_s19, 1 }
   0xa   : > { %p1702_p4 = por %p1692_p1, %p52_p0  ;;  %p1321_p5 = scmp.ge.s32.totalorder %s1617_s17, 1 }
   0xb   : > { %p1707_p6 = por %p131_p3, %p52_p0  ;;  %p138_p7 = scmp.lt.s32.totalorder %s1617_s17, 3 }
   0xc   : > { %s2321_s22 = scalar_select %p1702_p4, 1, 0 }
   0xd   : > { %s2322_s23 = scalar_select %p1707_p6, 1, 0 }
   0xe   : > { %p1712_p8 = pnand %p1321_p5, %p138_p7  ;;  %s1619_s25 = smov [#allocation6]  }
   0xf   : > { %s153_s26 = sshll.u32 %s1619_s25, 4  ;;  %s32_s28 = sadd.s32 1, %s1613_s16  ;;  %s154_s26 = int_to_ptr.vmem [resolvable:$true] %s153_s26 }
  0x10   : > { %p1388_p9 = pneg %p1712_p8  ;;  %s1490_s29 = scalar_lea.vmem %s154_s26, 1024 }
  0x11   : > { %p1491_p13 = scmp.ne.s32.totalorder %s154_s26, %s1490_s29  ;;  %p1498_p5 = scmp.lt.s32.totalorder %s154_s26, %s154_s26 }
  0x12   : > { %p1721_p11 = pnand %p1388_p9, %p1692_p1  ;;  %p1499_p7 = scmp.lt.s32.totalorder %s1490_s29, %s1490_s29 }
  0x14   : > { %p1481_p12 = pneg %p1721_p11  ;;  %p1500_p6 = por %p1499_p7, %p1498_p5 }
  0x16   : > { %p1493_p0 = pnand %p1491_p13, %p1481_p12 }
  0x18   : > { %p1494_p3 = pneg %p1493_p0 }
  0x1a   : > { %p1501_p4 = pnand %p1500_p6, %p1494_p3 }
  0x1c   : > { %1504 = shalt.err (!%p1501_p4)
}
  0x1d   : > { %s1620_s30 = smov 64   ;;  %s1621_s4 = smov 4  }
  0x1e   : > { %1391 = dma.hbm_to_vmem [thread:$0]  (!%p1721_p11), %s2313_s1, 1024, %s154_s26, [#allocation7], %s1620_s30, %s1620_s30, %s1621_s4  }
  0x1f   : > { %p34_p6 = scmp.ge.s32.totalorder %s32_s28, 2  ;;  %s39_s7 = sadd.s32 1, %s1605_s14 }
  0x20   : > { %p46_p4 = scmp.ne.s32.totalorder %s1605_s14, %s1601_s13  ;;  %p47_p9 = scmp.eq.s32.totalorder %s1617_s17, 0 }
  0x21   : > { %s2349_s28 = smov (%p34_p6, %s32_s28), 0  ;;  %p1401_p0 = scmp.lt.s32.totalorder %s1617_s17, 2 }
  0x22   : > { %p1739_p12 = por %p47_p9, %p46_p4  ;;  %p1745_p13 = por %p1696_p2, %p46_p4 }
  0x23   : > { %s36_s10 = ssub.s32 %s1613_s16, %s2349_s28  ;;  %s170_s11 = sand.u32 1, %s1605_s14  }
  0x24   : > { %p37_p11 = scmp.eq.s32.totalorder %s36_s10, 0  ;;  %s1324_s18 = sshll.u32 %s170_s11, 8 }
  0x25   : > { %s1362_s25 = sshll.u32 %s1613_s16, 12  ;;  %s174_s30 = scalar_lea.vmem [#allocation3], %s1324_s18 }
  0x26   : > { %s1754_s19 = scalar_select %p37_p11, %s1605_s14, %s39_s7  }
  0x27   : > { %s180_s29 = scalar_lea.hbm %s2312_s0, %s1362_s25  ;;  %s181_s4 = sshll.u32 %s174_s30, 4  ;;  %s182_s4 = int_to_ptr.vmem [resolvable:$true] %s181_s4 }
  0x28   : > { %p1762_p2 = pnand %p1401_p0, %p1739_p12  ;;  %s171_s5 = scalar_lea.sflag [#allocation4], %s170_s11 }
  0x29   : > { %s1518_s6 = scalar_lea.vmem %s182_s4, 4096  ;;  %s1622_s7 = smov [#allocation3]  }
  0x2a   : > { %p1507_p3 = pneg %p1762_p2  ;;  %p1519_p5 = scmp.ne.s32.totalorder %s182_s4, %s1518_s6 }
  0x2b   : > { %s1523_s10 = sshll.u32 %s1622_s7, 4  ;;  %s1524_s10 = int_to_ptr.vmem [resolvable:$false] %s1523_s10 }
  0x2c   : > { %p1521_p7 = pnand %p1519_p5, %p1507_p3  ;;  %s1525_s25 = scalar_lea.vmem %s1524_s10, 8192 }
  0x2d   : > { %p1526_p4 = scmp.lt.s32.totalorder %s182_s4, %s1524_s10  ;;  %p1527_p9 = scmp.lt.s32.totalorder %s1525_s25, %s1518_s6 }
  0x2e   : > { %p1522_p6 = pneg %p1521_p7 }
  0x2f   : > { %p1528_p11 = por %p1527_p9, %p1526_p4 }
  0x31   : > { %p1529_p10 = pnand %p1528_p11, %p1522_p6 }
  0x33   : > { %1532 = shalt.err (!%p1529_p10)
}
  0x34   : > { %s1623_s8 = smov 256   ;;  %s1624_s18 = smov 16  }
  0x35   : > { %1395 = dma.hbm_to_vmem [thread:$0]  (!%p1762_p2), %s180_s29, 4096, %s182_s4, %s171_s5, %s1623_s8, %s1623_s8, %s1624_s18  }
  0x36   : > { %193 = sbr.rel (%p1712_p8) target bundleno = 1000 (0x3e8), region = 32  ;;  %s1773_s11 = sand.u32 (!%p1712_p8), 1, %s1601_s13  }
  0x37   : > { %s1328_s26 = sshll.u32 (!%p1712_p8), %s1773_s11, 8  ;;  %s196_s27 = scalar_lea.sflag (!%p1712_p8), [#allocation4], %s1773_s11 }
  0x38   : > { %s1777_s30 = scalar_lea.vmem (!%p1712_p8), [#allocation3], %s1328_s26  ;;  %p2328_p12 = scmp.ne.s32.totalorder (!%p1712_p8), %s2321_s22, 0 }
  0x3b   : > { %1584 = dma.done.wait (%p2328_p12), %s196_s27, 4096  }
  0x3c   : > { %1586 = vsyncadd (%p2328_p12), %s196_s27, 4294963200 }
  0x3d   : > { %1588 = dma.done.wait (%p1692_p1), [#allocation7], 1024  }
  0x3e   : > { %1590 = vsyncadd (%p1692_p1), [#allocation7], 4294966272  ;;  %v1625_v0 = vmov 0   ;;  %v257_v1 = vld [vmem:[%s1777_s30 + $0xe8] sm:$0xff]  ;;  %v259_v2 = vld [vmem:[%s1777_s30 + $0xf8] sm:$0xff]  ;;  %s1626_s20 = smov 17  }
  0x3f   : > { %372 = vmatprep.mubr.bf16.mxu0 %v1625_v0  ;;  %412 = vmatprep.mubr.bf16.mxu1 %v1625_v0  ;;  %v256_v3 = vld [vmem:[%s1777_s30 + $0xe0] sm:$0xff]  ;;  %v275_v4 = vpack.c.bf16 %v259_v2, %v257_v1  ;;  %v258_v5 = vld [vmem:[%s1777_s30 + $0xf0] sm:$0xff]  ;;  %v253_v6 = vld [vmem:[%s1777_s30 + $0xc8] sm:$0xff]  ;;  %vm614_vm0 = vcmask 1047688   ;;  %vm549_vm1 = vcmask 138240   ;;  %s1627_s22 = smov 127  }
  0x40   : > { %v255_v7 = vld [vmem:[%s1777_s30 + $0xd8] sm:$0xff]  ;;  %v274_v8 = vpack.c.bf16 %v258_v5, %v256_v3  ;;  %v252_v10 = vld [vmem:[%s1777_s30 + $0xc0] sm:$0xff]  ;;  %v254_v11 = vld [vmem:[%s1777_s30 + $0xd0] sm:$0xff]  ;;  %s1628_s24 = smov 112   ;;  %vm735_vm7 = vcmask 1039360   ;;  %vm699_vm9 = vcmask 916480  }
  0x41   : > { %v273_v9 = vpack.c.bf16 %v255_v7, %v253_v6  ;;  %v249_v12 = vld [vmem:[%s1777_s30 + $0xa8] sm:$0xff]  ;;  %340 = vmatprep.subr.bf16.mxu0 %v275_v4  ;;  %1364 = vmatprep.subr.bf16.mxu1 %v275_v4  ;;  %v251_v13 = vld [vmem:[%s1777_s30 + $0xb8] sm:$0xff]  ;;  %v272_v14 = vpack.c.bf16 %v254_v11, %v252_v10  ;;  %v248_v16 = vld [vmem:[%s1777_s30 + $0xa0] sm:$0xff]  ;;  %s1629_s21 = smov 110   ;;  %s1630_s5 = smov 111  }
  0x42   : > { %341 = vmatpush1.bf16.msra.mxu0 %v274_v8  ;;  %1372 = vmatpush1.bf16.msra.mxu1 %v274_v8  ;;  %v271_v15 = vpack.c.bf16 %v251_v13, %v249_v12  ;;  %v250_v17 = vld [vmem:[%s1777_s30 + $0xb0] sm:$0xff]  ;;  %v245_v18 = vld [vmem:[%s1777_s30 + $0x88] sm:$0xff]  ;;  %v247_v19 = vld [vmem:[%s1777_s30 + $0x98] sm:$0xff]  ;;  %s1631_s6 = smov 126   ;;  %s1632_s7 = smov 96  }
  0x43   : > { %342 = vmatprep.subr.bf16.mxu0 %v273_v9  ;;  %1365 = vmatprep.subr.bf16.mxu1 %v273_v9  ;;  %v270_v20 = vpack.c.bf16 %v250_v17, %v248_v16  ;;  %v269_v21 = vpack.c.bf16 %v247_v19, %v245_v18  ;;  %v244_v22 = vld [vmem:[%s1777_s30 + $0x80] sm:$0xff]  ;;  %v246_v23 = vld [vmem:[%s1777_s30 + $0x90] sm:$0xff]  ;;  %v241_v24 = vld [vmem:[%s1777_s30 + $0x68] sm:$0xff]  ;;  %s1633_s10 = smov 94   ;;  %s1634_s25 = smov 95  }
  0x44   : > { %v243_v25 = vld [vmem:[%s1777_s30 + $0x78] sm:$0xff]  ;;  %v240_v26 = vld [vmem:[%s1777_s30 + $0x60] sm:$0xff]  ;;  %v268_v27 = vpack.c.bf16 %v246_v23, %v244_v22  ;;  %v242_v28 = vld [vmem:[%s1777_s30 + $0x70] sm:$0xff]  ;;  %s1330_s8 = sshll.u32 %s1773_s11, 6  ;;  %s1363_s18 = sshll.u32 %s1609_s15, 10 }
  0x45   : > { %v267_v29 = vpack.c.bf16 %v243_v25, %v241_v24  ;;  %v237_v30 = vld [vmem:[%s1777_s30 + $0x48] sm:$0xff]  ;;  %v239_v31 = vld [vmem:[%s1777_s30 + $0x58] sm:$0xff]  ;;  %v266_v32 = vpack.c.bf16 %v242_v28, %v240_v26  ;;  %v236_v33 = vld [vmem:[%s1777_s30 + $0x40] sm:$0xff]  ;;  %s225_s26 = scalar_lea.vmem [#allocation8], %s1330_s8  ;;  %s1208_s15 = scalar_lea.sflag [#allocation5], %s1773_s11 }
  0x46   : > { %343 = vmatpush1.bf16.msra.mxu0 %v272_v14  ;;  %1373 = vmatpush1.bf16.msra.mxu1 %v272_v14  ;;  %v265_v34 = vpack.c.bf16 %v239_v31, %v237_v30  ;;  %v238_v35 = vld [vmem:[%s1777_s30 + $0x50] sm:$0xff]  ;;  %v233_v36 = vld [vmem:[%s1777_s30 + $0x28] sm:$0xff]  ;;  %v235_v37 = vld [vmem:[%s1777_s30 + $0x38] sm:$0xff]  ;;  %s1223_s27 = sshll.u32 %s225_s26, 4  ;;  %s1635_s29 = smov [#allocation8]   ;;  %s2264_s27 = int_to_ptr.vmem [resolvable:$true] %s1223_s27 }
  0x47   : > { %344 = vmatprep.subr.bf16.mxu0 %v271_v15  ;;  %1366 = vmatprep.subr.bf16.mxu1 %v271_v15  ;;  %v264_v38 = vpack.c.bf16 %v238_v35, %v236_v33  ;;  %v263_v39 = vpack.c.bf16 %v235_v37, %v233_v36  ;;  %v232_v40 = vld [vmem:[%s1777_s30 + $0x20] sm:$0xff]  ;;  %v234_v41 = vld [vmem:[%s1777_s30 + $0x30] sm:$0xff]  ;;  %v229_v42 = vld [vmem:[%s1777_s30 + $0x8] sm:$0xff]  ;;  %s1537_s4 = sshll.u32 %s1635_s29, 4  ;;  %s1538_s4 = int_to_ptr.vmem [resolvable:$false] %s1537_s4 }
  0x48   : > { %v231_v43 = vld [vmem:[%s1777_s30 + $0x18] sm:$0xff]  ;;  %v262_v44 = vpack.c.bf16 %v234_v41, %v232_v40  ;;  %v228_v46 = vld [vmem:[%s1777_s30] sm:$0xff]  ;;  %v230_v47 = vld [vmem:[%s1777_s30 + $0x10] sm:$0xff]  ;;  %v663_v40 = vlaneseq  ;;  %p1540_p0 = scmp.lt.s32.totalorder %s2264_s27, %s1538_s4 }
  0x49   : > { %v261_v45 = vpack.c.bf16 %v231_v43, %v229_v42  ;;  %v260_v48 = vpack.c.bf16 %v230_v47, %v228_v46  ;;  %v1469_v49 = vld [vmem:[#allocation6] sm:$0xff]   ;;  %v1471_v51 = vld [vmem:[#allocation6 + $0x8] sm:$0xff]   ;;  %v1473_v53 = vld [vmem:[#allocation6 + $0x10] sm:$0xff]  }
  0x4a   : > { %345 = vmatpush1.bf16.msra.mxu0 %v270_v20  ;;  %1374 = vmatpush1.bf16.msra.mxu1 %v270_v20  ;;  %v1470_v50 = vld [vmem:[#allocation6 + $0x20] sm:$0xff]   ;;  %v1472_v52 = vld [vmem:[#allocation6 + $0x28] sm:$0xff]   ;;  %v1474_v54 = vld [vmem:[#allocation6 + $0x30] sm:$0xff]   ;;  %v1912_v42 = vshrl.u32 %v663_v40, 7 }
  0x4b   : > { %346 = vmatprep.subr.bf16.mxu0 %v269_v21  ;;  %1367 = vmatprep.subr.bf16.mxu1 %v269_v21  ;;  %v1475_v55 = vld [vmem:[#allocation6 + $0x18] sm:$0xff]   ;;  %v1907_v41 = vld [vmem:[%s2314_s2] sm:$0x3] }
  0x4c   : > { %v1476_v56 = vld [vmem:[#allocation6 + $0x38] sm:$0xff]   ;;  %vm671_vm2 = vcmp.ge.s32.totalorder %v1907_v41, 1  ;;  %v1915_v43 = vsub.s32 0, %v1912_v42  ;;  %vm672_vm13 = vcmp.lt.s32.totalorder %v1907_v41, 15 }
  0x4e   : > { %347 = vmatpush1.bf16.msra.mxu0 %v268_v27  ;;  %1375 = vmatpush1.bf16.msra.mxu1 %v268_v27 }
  0x4f   : > { %348 = vmatprep.subr.bf16.mxu0 %v267_v29  ;;  %1368 = vmatprep.subr.bf16.mxu1 %v267_v29 }
  0x52   : > { %349 = vmatpush1.bf16.msra.mxu0 %v266_v32  ;;  %1376 = vmatpush1.bf16.msra.mxu1 %v266_v32 }
  0x53   : > { %350 = vmatprep.subr.bf16.mxu0 %v265_v34  ;;  %1369 = vmatprep.subr.bf16.mxu1 %v265_v34 }
  0x56   : > { %351 = vmatpush1.bf16.msra.mxu0 %v264_v38  ;;  %1377 = vmatpush1.bf16.msra.mxu1 %v264_v38 }
  0x57   : > { %352 = vmatprep.subr.bf16.mxu0 %v263_v39  ;;  %1370 = vmatprep.subr.bf16.mxu1 %v263_v39 }
  0x5a   : > { %353 = vmatpush1.bf16.msra.mxu0 %v262_v44  ;;  %1378 = vmatpush1.bf16.msra.mxu1 %v262_v44  ;;  %v679_v44 = vsel %vm671_vm2, 1, %v1625_v0  ;;  %vm904_vm2 = vcmask 1031168  }
  0x5b   : > { %354 = vmatprep.subr.bf16.mxu0 %v261_v45  ;;  %1371 = vmatprep.subr.bf16.mxu1 %v261_v45  ;;  %v1922_v45 = vand.u32 127, %v663_v40  ;;  %v1925_v46 = vrot.slane %v679_v44, %v1915_v43 }
  0x5d   : > { %vm667_vm3 = vcmp.ge.s32.totalorder %v1922_v45, 16  ;;  %vm757_vm4 = vcmp.ne.s32.totalorder %v1925_v46, 0  ;;  %vm688_vm10 = vcmp.eq.s32.totalorder %v1925_v46, 1 }
  0x5e   : > { %355 = vmatpush1.bf16.msra.mxu0 %v260_v48  ;;  %1379 = vmatpush1.bf16.msra.mxu1 %v260_v48  ;;  %vm759_vm5 = vmand %vm667_vm3, %vm757_vm4 }
  0x5f   : > { %v761_v47 = vsel %vm759_vm5, 1, %v1625_v0 }
  0x60   : > { %v766_v48 = vrot.slane %v761_v47, %v1915_v43 }
  0x61   : > { %373 = vmatmul.mubr.bf16.vlgmr.msra.gmra.mxu0 %v1469_v49  ;;  %413 = vmatmul.mubr.bf16.vlgmr.msra.gmra.mxu1 %v1470_v50 }
  0x62   : > { %382 = vmatprep.mubr.bf16.mxu0 %v1625_v0  ;;  %422 = vmatprep.mubr.bf16.mxu1 %v1625_v0  ;;  %vm771_vm6 = vcmp.eq.s32.totalorder %v766_v48, 1 }
  0x69   : > { %383 = vmatmul.mubr.bf16.gmra.mxu0 %v1471_v51  ;;  %423 = vmatmul.mubr.bf16.gmra.mxu1 %v1472_v52  ;;  %v686_v51 = vsub.s32 1, %v1912_v42 }
  0x6a   : > { %392 = vmatprep.mubr.bf16.mxu0 %v1625_v0  ;;  %432 = vmatprep.mubr.bf16.mxu1 %v1625_v0 }
  0x71   : > { %393 = vmatmul.mubr.bf16.gmra.mxu0 %v1473_v53  ;;  %433 = vmatmul.mubr.bf16.gmra.mxu1 %v1474_v54 }
  0x72   : > { %402 = vmatprep.mubr.bf16.mxu0 %v1625_v0  ;;  %442 = vmatprep.mubr.bf16.mxu1 %v1625_v0 }
  0x79   : > { %403 = vmatmul.mubr.bf16.gmra.mxu0 %v1475_v55  ;;  %443 = vmatmul.mubr.bf16.gmra.mxu1 %v1476_v56  ;;  %v1960_v55 = vrot.slane %v679_v44, %v686_v51 }
  0x7b   : > { %vm758_vm8 = vcmp.ne.s32.totalorder %v1960_v55, 0  ;;  %vm689_vm11 = vcmp.eq.s32.totalorder %v1960_v55, 1 }
 0x121   : > { %v374_v57 = vpop.f32.mrf.mxu0  ;;  %v1827_v58 = vpop.f32.mrf.mxu1 }
 0x123   : > { %v1829_v59 = vpop.f32.mrf.mxu0  ;;  %v1831_v60 = vpop.f32.mrf.mxu1 }
 0x125   : > { %v1833_v61 = vpop.f32.mrf.mxu0  ;;  %v1835_v62 = vpop.f32.mrf.mxu1 }
 0x127   : > { %v1837_v63 = vpop.f32.mrf.mxu0  ;;  %v1839_v1 = vpop.f32.mrf.mxu1 }
 0x129   : > { %v1841_v2 = vpop.f32.mrf.mxu0  ;;  %v1843_v3 = vpop.f32.mrf.mxu1 }
 0x12b   : > { %v1845_v4 = vpop.f32.mrf.mxu0  ;;  %v1847_v5 = vpop.f32.mrf.mxu1 }
 0x12d   : > { %v388_v6 = vpop.f32.mrf.mxu0  ;;  %v1849_v7 = vpop.f32.mrf.mxu1 }
 0x12f   : > { %v390_v8 = vpop.f32.mrf.mxu0  ;;  %v1851_v9 = vpop.f32.mrf.mxu1 }
 0x131   : > { %v394_v10 = vpop.f32.mrf.mxu0  ;;  %v1853_v11 = vpop.f32.mrf.mxu1 }
 0x133   : > { %v396_v12 = vpop.f32.mrf.mxu0  ;;  %v1855_v13 = vpop.f32.mrf.mxu1 }
 0x135   : > { %v398_v14 = vpop.f32.mrf.mxu0  ;;  %v438_v15 = vpop.f32.mrf.mxu1 }
 0x136   : > { %537 = vrot.lane.b32.xlu1 %v438_v15, %s1626_s20 }
 0x137   : > { %v400_v16 = vpop.f32.mrf.mxu0  ;;  %v440_v17 = vpop.f32.mrf.mxu1 }
 0x139   : > { %v404_v18 = vpop.f32.mrf.mxu0  ;;  %v1858_v19 = vpop.f32.mrf.mxu1 }
 0x13a   : > { %539 = vrot.lane.b32.xlu1 %v440_v17, %s1626_s20 }
 0x13b   : > { %v406_v20 = vpop.f32.mrf.mxu0  ;;  %v1861_v21 = vpop.f32.mrf.mxu1 }
 0x13d   : > { %v408_v22 = vpop.f32.mrf.mxu0  ;;  %v448_v23 = vpop.f32.mrf.mxu1 }
 0x13e   : > { %513 = vrot.lane.b32.xlu0 %v408_v22, %s1626_s20 }
 0x13f   : > { %v450_v24 = vpop.f32.mrf.mxu1  ;;  %v410_v25 = vpop.f32.mrf.mxu0 }
 0x140   : > { %547 = vrot.lane.b32.xlu1 %v450_v24, %s1626_s20 }
 0x142   : > { %515 = vrot.lane.b32.xlu0 %v410_v25, %s1626_s20 }
 0x146   : > { %545 = vrot.lane.b32.xlu0 %v448_v23, %s1626_s20 }
 0x14a   : > { %485 = vrot.lane.b32.xlu0 %v374_v57, %s1626_s20 }
 0x1a8   : > { %v538_v26 = vpop.permute.xlu1 %537 }
 0x1a9   : > { %654 = vst.msk [vmem:[#allocation2 + $0x138] sm:$0xff] %vm614_vm0, %v538_v26 }
 0x1ac   : > { %v540_v27 = vpop.permute.xlu1 %539 }
 0x1ad   : > { %v563_v28 = vsel %vm549_vm1, %v538_v26, %v540_v27  ;;  %656 = vst.msk [vmem:[#allocation2 + $0x148] sm:$0xff] %vm549_vm1, %v540_v27 }
 0x1ae   : > { %731 = vrot.lane.b32.xlu0 %v563_v28, %s1627_s22 }
 0x1b0   : > { %v514_v29 = vpop.permute.xlu0 %513  ;;  %v719_v30 = vld [vmem:[#allocation2 + $0x138] sm:$0xff] }
 0x1b1   : > { %636 = vst.msk [vmem:[#allocation2 + $0xa8] sm:$0xff] %vm614_vm0, %v514_v29  ;;  %729 = vrot.lane.b32.xlu1 %v719_v30, %s1627_s22 }
 0x1b2   : > { %v548_v31 = vpop.permute.xlu1 %547 }
 0x1b4   : > { %v516_v32 = vpop.permute.xlu0 %515  ;;  %v721_v33 = vld [vmem:[#allocation2 + $0x148] sm:$0xff] }
 0x1b5   : > { %v557_v34 = vsel %vm549_vm1, %v514_v29, %v516_v32  ;;  %638 = vst.msk [vmem:[#allocation2 + $0xb8] sm:$0xff] %vm549_vm1, %v516_v32  ;;  %733 = vrot.lane.b32.xlu1 %v721_v33, %s1627_s22 }
 0x1b8   : > { %v546_v35 = vpop.permute.xlu0 %545  ;;  %v676_v36 = vld [vmem:[#allocation2 + $0xa8] sm:$0xff] }
 0x1b9   : > { %660 = vst.msk [vmem:[#allocation2 + $0x168] sm:$0xff] %vm614_vm0, %v546_v35  ;;  %693 = vrot.lane.b32.xlu0 %v676_v36, %s1628_s24  ;;  %695 = vrot.lane.b32.xlu1 %v557_v34, %s1628_s24  ;;  %v1881_v37 = vsel %vm549_vm1, %v546_v35, %v548_v31 }
 0x1bc   : > { %v1883_v38 = vpop.permute.xlu0 %485  ;;  %v678_v39 = vld [vmem:[#allocation2 + $0xb8] sm:$0xff] }
 0x1bd   : > { %615 = vst.msk [vmem:[#allocation2] sm:$0xff] %vm614_vm0, %v1883_v38  ;;  %697 = vrot.lane.b32.xlu0 %v678_v39, %s1628_s24  ;;  %487 = vrot.lane.b32.xlu1 %v1829_v59, %s1626_s20 }
 0x1c0   : > { %v755_v49 = vld [vmem:[#allocation2 + $0x168] sm:$0xff] }
 0x1c1   : > { %489 = vrot.lane.b32.xlu0 %v1833_v61, %s1626_s20  ;;  %491 = vrot.lane.b32.xlu1 %v1837_v63, %s1626_s20  ;;  %v773_v50 = vsel %vm771_vm6, %v755_v49, 0.0  ;;  %v762_v61 = vsel %vm758_vm8, 1, %v1625_v0  ;;  %vm797_vm6 = vcmask 908288  }
 0x1c5   : > { %493 = vrot.lane.b32.xlu0 %v1841_v2, %s1626_s20  ;;  %495 = vrot.lane.b32.xlu1 %v1845_v4, %s1626_s20 }
 0x1c9   : > { %497 = vrot.lane.b32.xlu0 %v388_v6, %s1626_s20  ;;  %499 = vrot.lane.b32.xlu1 %v390_v8, %s1626_s20 }
 0x1cd   : > { %501 = vrot.lane.b32.xlu0 %v394_v10, %s1626_s20  ;;  %503 = vrot.lane.b32.xlu1 %v396_v12, %s1626_s20 }
 0x1d1   : > { %505 = vrot.lane.b32.xlu0 %v398_v14, %s1626_s20  ;;  %507 = vrot.lane.b32.xlu1 %v400_v16, %s1626_s20 }
 0x1d5   : > { %509 = vrot.lane.b32.xlu0 %v404_v18, %s1626_s20  ;;  %511 = vrot.lane.b32.xlu1 %v406_v20, %s1626_s20 }
 0x1d9   : > { %517 = vrot.lane.b32.xlu0 %v1827_v58, %s1626_s20  ;;  %519 = vrot.lane.b32.xlu1 %v1831_v60, %s1626_s20 }
 0x1dd   : > { %533 = vrot.lane.b32.xlu0 %v1853_v11, %s1626_s20  ;;  %535 = vrot.lane.b32.xlu1 %v1855_v13, %s1626_s20 }
 0x1e1   : > { %541 = vrot.lane.b32.xlu0 %v1858_v19, %s1626_s20  ;;  %543 = vrot.lane.b32.xlu1 %v1861_v21, %s1626_s20 }
 0x1e5   : > { %521 = vrot.lane.b32.xlu0 %v1835_v62, %s1626_s20  ;;  %523 = vrot.lane.b32.xlu1 %v1839_v1, %s1626_s20  ;;  %v770_v1 = vrot.slane %v762_v61, %v1915_v43 }
 0x1e7   : > { %vm772_vm12 = vcmp.eq.s32.totalorder %v770_v1, 1 }
 0x1e8   : > { %v774_v10 = vsel %vm772_vm12, %v1881_v37, 0.0 }
 0x1e9   : > { %529 = vrot.lane.b32.xlu0 %v1849_v7, %s1626_s20  ;;  %531 = vrot.lane.b32.xlu1 %v1851_v9, %s1626_s20 }
 0x1ed   : > { %525 = vrot.lane.b32.xlu0 %v1843_v3, %s1626_s20  ;;  %527 = vrot.lane.b32.xlu1 %v1847_v5, %s1626_s20 }
 0x1f1   : > { %777 = vrot.lane.b32.xlu0 %v773_v50, %s1626_s20 }
 0x220   : > { %v732_v53 = vpop.permute.xlu0 %731 }
 0x223   : > { %v730_v52 = vpop.permute.xlu1 %729 }
 0x224   : > { %v736_v54 = vsel %vm735_vm7, %v730_v52, %v732_v53 }
 0x225   : > { %v740_v56 = vsel %vm667_vm3, %v736_v54, 0.0 }
 0x226   : > { %744 = vrot.lane.b32.xlu0 %v740_v56, %s1626_s20 }
 0x227   : > { %v734_v57 = vpop.permute.xlu1 %733 }
 0x228   : > { %v737_v58 = vsel %vm735_vm7, %v732_v53, %v734_v57 }
 0x229   : > { %746 = vrot.lane.b32.xlu1 %v737_v58, %s1626_s20 }
 0x22b   : > { %v694_v59 = vpop.permute.xlu0 %693  ;;  %v696_v60 = vpop.permute.xlu1 %695 }
 0x22c   : > { %v700_v62 = vsel %vm699_vm9, %v694_v59, %v696_v60  ;;  %v1055_v59 = vld [vmem:[#allocation2] sm:$0xff] }
 0x22d   : > { %v704_v63 = vsel %vm688_vm10, %v700_v62, 0.0 }
 0x22e   : > { %708 = vrot.lane.b32.xlu0 %v704_v63, %s1626_s20 }
 0x22f   : > { %v698_v2 = vpop.permute.xlu0 %697  ;;  %v488_v3 = vpop.permute.xlu1 %487 }
 0x230   : > { %v701_v4 = vsel %vm699_vm9, %v696_v60, %v698_v2  ;;  %v1981_v5 = vsel %vm549_vm1, %v1883_v38, %v488_v3  ;;  %617 = vst.msk [vmem:[#allocation2 + $0x10] sm:$0xff] %vm549_vm1, %v488_v3 }
 0x231   : > { %v705_v6 = vsel %vm689_vm11, %v701_v4, 0.0 }
 0x232   : > { %710 = vrot.lane.b32.xlu1 %v705_v6, %s1626_s20 }
 0x233   : > { %v490_v7 = vpop.permute.xlu0 %489  ;;  %v492_v8 = vpop.permute.xlu1 %491 }
 0x234   : > { %618 = vst.msk [vmem:[#allocation2 + $0x18] sm:$0xff] %vm614_vm0, %v490_v7  ;;  %v1989_v9 = vsel %vm549_vm1, %v490_v7, %v492_v8 }
 0x235   : > { %620 = vst.msk [vmem:[#allocation2 + $0x28] sm:$0xff] %vm549_vm1, %v492_v8 }
 0x236   : > { %779 = vrot.lane.b32.xlu1 %v774_v10, %s1626_s20 }
 0x237   : > { %v494_v11 = vpop.permute.xlu0 %493  ;;  %v496_v12 = vpop.permute.xlu1 %495  ;;  %v1057_v60 = vld [vmem:[#allocation2 + $0x10] sm:$0xff] }
 0x238   : > { %621 = vst.msk [vmem:[#allocation2 + $0x30] sm:$0xff] %vm614_vm0, %v494_v11  ;;  %v1996_v13 = vsel %vm549_vm1, %v494_v11, %v496_v12 }
 0x239   : > { %623 = vst.msk [vmem:[#allocation2 + $0x40] sm:$0xff] %vm549_vm1, %v496_v12 }
 0x23b   : > { %v498_v14 = vpop.permute.xlu0 %497  ;;  %v500_v15 = vpop.permute.xlu1 %499  ;;  %v946_v3 = vld [vmem:[#allocation2 + $0x18] sm:$0xff] }
 0x23c   : > { %624 = vst.msk [vmem:[#allocation2 + $0x48] sm:$0xff] %vm614_vm0, %v498_v14  ;;  %v2001_v16 = vsel %vm549_vm1, %v498_v14, %v500_v15  ;;  %v948_v61 = vld [vmem:[#allocation2 + $0x28] sm:$0xff] }
 0x23d   : > { %626 = vst.msk [vmem:[#allocation2 + $0x58] sm:$0xff] %vm549_vm1, %v500_v15 }
 0x23f   : > { %v502_v17 = vpop.permute.xlu0 %501  ;;  %v504_v18 = vpop.permute.xlu1 %503 }
 0x240   : > { %627 = vst.msk [vmem:[#allocation2 + $0x60] sm:$0xff] %vm614_vm0, %v502_v17  ;;  %v554_v19 = vsel %vm549_vm1, %v502_v17, %v504_v18  ;;  %v1090_v62 = vld [vmem:[#allocation2 + $0x40] sm:$0xff] }
 0x241   : > { %629 = vst.msk [vmem:[#allocation2 + $0x70] sm:$0xff] %vm549_vm1, %v504_v18 }
 0x243   : > { %v506_v20 = vpop.permute.xlu0 %505  ;;  %v508_v21 = vpop.permute.xlu1 %507  ;;  %v969_v63 = vld [vmem:[#allocation2 + $0x48] sm:$0xff] }
 0x244   : > { %630 = vst.msk [vmem:[#allocation2 + $0x78] sm:$0xff] %vm614_vm0, %v506_v20  ;;  %v2009_v22 = vsel %vm549_vm1, %v506_v20, %v508_v21  ;;  %v971_v50 = vld [vmem:[#allocation2 + $0x58] sm:$0xff] }
 0x245   : > { %632 = vst.msk [vmem:[#allocation2 + $0x88] sm:$0xff] %vm549_vm1, %v508_v21 }
 0x247   : > { %v510_v23 = vpop.permute.xlu0 %509  ;;  %v828_v24 = vld [vmem:[#allocation2 + $0x60] sm:$0xff]  ;;  %v512_v25 = vpop.permute.xlu1 %511 }
 0x248   : > { %633 = vst.msk [vmem:[#allocation2 + $0x90] sm:$0xff] %vm614_vm0, %v510_v23  ;;  %845 = vrot.lane.b32.xlu0 %v828_v24, %s1629_s21  ;;  %v556_v26 = vsel %vm549_vm1, %v510_v23, %v512_v25  ;;  %v830_v31 = vld [vmem:[#allocation2 + $0x70] sm:$0xff] }
 0x249   : > { %635 = vst.msk [vmem:[#allocation2 + $0xa0] sm:$0xff] %vm549_vm1, %v512_v25 }
 0x24b   : > { %v518_v27 = vpop.permute.xlu0 %517  ;;  %v520_v28 = vpop.permute.xlu1 %519  ;;  %v673_v14 = vld [vmem:[#allocation2 + $0x78] sm:$0xff] }
 0x24c   : > { %639 = vst.msk [vmem:[#allocation2 + $0xc0] sm:$0xff] %vm614_vm0, %v518_v27  ;;  %847 = vrot.lane.b32.xlu0 %v554_v19, %s1629_s21  ;;  %v2019_v29 = vsel %vm549_vm1, %v518_v27, %v520_v28  ;;  %v675_v18 = vld [vmem:[#allocation2 + $0x88] sm:$0xff] }
 0x24d   : > { %641 = vst.msk [vmem:[#allocation2 + $0xd0] sm:$0xff] %vm549_vm1, %v520_v28 }
 0x24f   : > { %v534_v30 = vpop.permute.xlu0 %533  ;;  %v536_v32 = vpop.permute.xlu1 %535  ;;  %v858_v35 = vld [vmem:[#allocation2 + $0x90] sm:$0xff] }
 0x250   : > { %651 = vst.msk [vmem:[#allocation2 + $0x120] sm:$0xff] %vm614_vm0, %v534_v30  ;;  %849 = vrot.lane.b32.xlu0 %v830_v31, %s1629_s21  ;;  %v562_v33 = vsel %vm549_vm1, %v534_v30, %v536_v32  ;;  %v860_v48 = vld [vmem:[#allocation2 + $0xa0] sm:$0xff] }
 0x251   : > { %653 = vst.msk [vmem:[#allocation2 + $0x130] sm:$0xff] %vm549_vm1, %v536_v32 }
 0x253   : > { %v542_v34 = vpop.permute.xlu0 %541  ;;  %v544_v36 = vpop.permute.xlu1 %543  ;;  %v1108_v11 = vld [vmem:[#allocation2 + $0xc0] sm:$0xff] }
 0x254   : > { %657 = vst.msk [vmem:[#allocation2 + $0x150] sm:$0xff] %vm614_vm0, %v542_v34  ;;  %864 = vrot.lane.b32.xlu0 %v858_v35, %s1630_s5  ;;  %v564_v37 = vsel %vm549_vm1, %v542_v34, %v544_v36 }
 0x255   : > { %659 = vst.msk [vmem:[#allocation2 + $0x160] sm:$0xff] %vm549_vm1, %v544_v36 }
 0x257   : > { %v522_v38 = vpop.permute.xlu0 %521  ;;  %v524_v39 = vpop.permute.xlu1 %523  ;;  %v876_v54 = vld [vmem:[#allocation2 + $0x120] sm:$0xff] }
 0x258   : > { %v878_v40 = vld [vmem:[#allocation2 + $0x130] sm:$0xff]  ;;  %642 = vst.msk [vmem:[#allocation2 + $0xd8] sm:$0xff] %vm614_vm0, %v522_v38  ;;  %866 = vrot.lane.b32.xlu0 %v556_v26, %s1630_s5  ;;  %v559_v44 = vsel %vm549_vm1, %v522_v38, %v524_v39 }
 0x259   : > { %644 = vst.msk [vmem:[#allocation2 + $0xe8] sm:$0xff] %vm549_vm1, %v524_v39  ;;  %902 = vrot.lane.b32.xlu1 %v878_v40, %s1631_s6 }
 0x25b   : > { %v530_v47 = vpop.permute.xlu0 %529  ;;  %v532_v49 = vpop.permute.xlu1 %531  ;;  %v913_v57 = vld [vmem:[#allocation2 + $0x150] sm:$0xff] }
 0x25c   : > { %648 = vst.msk [vmem:[#allocation2 + $0x108] sm:$0xff] %vm614_vm0, %v530_v47  ;;  %868 = vrot.lane.b32.xlu0 %v860_v48, %s1630_s5  ;;  %v561_v52 = vsel %vm549_vm1, %v530_v47, %v532_v49  ;;  %v915_v8 = vld [vmem:[#allocation2 + $0x160] sm:$0xff] }
 0x25d   : > { %650 = vst.msk [vmem:[#allocation2 + $0x118] sm:$0xff] %vm549_vm1, %v532_v49  ;;  %993 = vrot.lane.b32.xlu1 %v971_v50, %s1632_s7 }
 0x25f   : > { %v526_v53 = vpop.permute.xlu0 %525  ;;  %v528_v56 = vpop.permute.xlu1 %527  ;;  %v1004_v1 = vld [vmem:[#allocation2 + $0xd8] sm:$0xff] }
 0x260   : > { %645 = vst.msk [vmem:[#allocation2 + $0xf0] sm:$0xff] %vm614_vm0, %v526_v53  ;;  %898 = vrot.lane.b32.xlu0 %v876_v54, %s1631_s6  ;;  %v2040_v58 = vsel %vm549_vm1, %v526_v53, %v528_v56  ;;  %v1006_v2 = vld [vmem:[#allocation2 + $0xe8] sm:$0xff]  ;;  %v831_v54 = vsel %vm672_vm13, 1, %v1625_v0 }
 0x261   : > { %647 = vst.msk [vmem:[#allocation2 + $0x100] sm:$0xff] %vm549_vm1, %v528_v56  ;;  %919 = vrot.lane.b32.xlu1 %v913_v57, %s1627_s22 }
 0x263   : > { %v1022_v4 = vld [vmem:[#allocation2 + $0x108] sm:$0xff]  ;;  %v778_v10 = vpop.permute.xlu0 %777 }
 0x264   : > { %900 = vrot.lane.b32.xlu0 %v562_v33, %s1631_s6  ;;  %v1024_v6 = vld [vmem:[#allocation2 + $0x118] sm:$0xff] }
 0x265   : > { %1075 = vrot.lane.b32.xlu1 %v1055_v59, %s1633_s10 }
 0x267   : > { %v1128_v7 = vld [vmem:[#allocation2 + $0xf0] sm:$0xff] }
 0x268   : > { %958 = vrot.lane.b32.xlu0 %v1989_v9, %s1634_s25  ;;  %v1088_v9 = vld [vmem:[#allocation2 + $0x30] sm:$0xff]  ;;  %v1130_v34 = vld [vmem:[#allocation2 + $0x100] sm:$0xff] }
 0x269   : > { %1079 = vrot.lane.b32.xlu1 %v1057_v60, %s1633_s10  ;;  %v2094_v60 = vrot.slane %v831_v54, %v686_v51 }
 0x26b   : > { %vm2318_vm15 = vcmp.ne.s32.totalorder %v2094_v60, 0  ;;  %vm841_vm12 = vcmp.eq.s32.totalorder %v2094_v60, 1 }
 0x26c   : > { %960 = vrot.lane.b32.xlu0 %v948_v61, %s1634_s25 }
 0x26d   : > { %1098 = vrot.lane.b32.xlu1 %v1090_v62, %s1634_s25 }
 0x270   : > { %989 = vrot.lane.b32.xlu0 %v969_v63, %s1632_s7  ;;  %v884_v63 = vsel %vm2318_vm15, 1, %v1625_v0 }
 0x271   : > { %1010 = vrot.lane.b32.xlu1 %v1004_v1, %s1630_s5 }
 0x274   : > { %991 = vrot.lane.b32.xlu0 %v2001_v16, %s1632_s7 }
 0x275   : > { %1014 = vrot.lane.b32.xlu1 %v1006_v2, %s1630_s5  ;;  %v892_v2 = vrot.slane %v884_v63, %v1915_v43 }
 0x278   : > { %956 = vrot.lane.b32.xlu0 %v946_v3, %s1634_s25  ;;  %v2112_v3 = vadd.s32 128, %v1922_v45 }
 0x279   : > { %1028 = vrot.lane.b32.xlu1 %v1022_v4, %s1628_s24 }
 0x27c   : > { %921 = vrot.lane.b32.xlu0 %v564_v37, %s1627_s22 }
 0x27d   : > { %1032 = vrot.lane.b32.xlu1 %v1024_v6, %s1628_s24 }
 0x280   : > { %1077 = vrot.lane.b32.xlu0 %v1981_v5, %s1633_s10  ;;  %v1110_v5 = vld [vmem:[#allocation2 + $0xd0] sm:$0xff] }
 0x281   : > { %1116 = vrot.lane.b32.xlu1 %v2019_v29, %s1629_s21 }
 0x284   : > { %1096 = vrot.lane.b32.xlu0 %v1996_v13, %s1634_s25 }
 0x285   : > { %1134 = vrot.lane.b32.xlu1 %v1128_v7, %s1630_s5 }
 0x288   : > { %923 = vrot.lane.b32.xlu0 %v915_v8, %s1627_s22  ;;  %s2262_s22 = scalar_lea.hbm %s2315_s3, %s1363_s18 }
 0x28c   : > { %1012 = vrot.lane.b32.xlu0 %v559_v44, %s1630_s5 }
 0x290   : > { %1094 = vrot.lane.b32.xlu0 %v1088_v9, %s1634_s25 }
 0x294   : > { %1030 = vrot.lane.b32.xlu0 %v561_v52, %s1628_s24  ;;  %s1533_s24 = scalar_lea.vmem %s2264_s27, 1024 }
 0x295   : > { %p1534_p1 = scmp.ne.s32.totalorder %s2264_s27, %s1533_s24 }
 0x297   : > { %p1535_p8 = pnand %p1534_p1, %p1745_p13 }
 0x298   : > { %1114 = vrot.lane.b32.xlu0 %v1108_v11, %s1629_s21  ;;  %v745_v12 = vpop.permute.xlu0 %744 }
 0x299   : > { %p1536_p10 = pneg %p1535_p8 }
 0x29b   : > { %v747_v13 = vpop.permute.xlu1 %746 }
 0x29c   : > { %1118 = vrot.lane.b32.xlu0 %v1110_v5, %s1629_s21  ;;  %v748_v25 = vsel %vm549_vm1, %v745_v12, %v747_v13  ;;  %s1539_s21 = scalar_lea.vmem %s1538_s4, 2048 }
 0x29d   : > { %p1541_p2 = scmp.lt.s32.totalorder %s1539_s21, %s1533_s24 }
 0x29f   : > { %p1542_p3 = por %p1541_p2, %p1540_p0 }
 0x2a0   : > { %v709_v15 = vpop.permute.xlu0 %708 }
 0x2a1   : > { %v716_v16 = vadd.f32 %v709_v15, %v673_v14  ;;  %p1543_p5 = pnand %p1542_p3, %p1536_p10 }
 0x2a3   : > { %v752_v17 = vadd.f32 %v745_v12, %v716_v16 }
 0x2a4   : > { %v711_v19 = vpop.permute.xlu1 %710 }
 0x2a5   : > { %v718_v20 = vadd.f32 %v711_v19, %v675_v18  ;;  %v712_v21 = vsel %vm549_vm1, %v709_v15, %v711_v19  ;;  %v785_v23 = vadd.f32 %v778_v10, %v752_v17 }
 0x2a6   : > { %v717_v24 = vadd.f32 %v712_v21, %v2009_v22 }
 0x2a7   : > { %v754_v26 = vadd.f32 %v747_v13, %v718_v20  ;;  %791 = vrot.lane.b32.xlu0 %v785_v23, %s1630_s5  ;;  %v808_v32 = vmul.f32 %v785_v23, %v785_v23 }
 0x2a8   : > { %v780_v27 = vpop.permute.xlu1 %779  ;;  %v753_v28 = vadd.f32 %v748_v25, %v717_v24 }
 0x2a9   : > { %v781_v29 = vsel %vm549_vm1, %v778_v10, %v780_v27  ;;  %v787_v30 = vadd.f32 %v780_v27, %v754_v26  ;;  %vm851_vm1 = vcmask 900096   ;;  %v974_v27 = vsel %vm757_vm4, 1, %v1625_v0 }
 0x2aa   : > { %v786_v31 = vadd.f32 %v781_v29, %v753_v28  ;;  %v979_v45 = vrot.slane %v974_v27, %v1915_v43 }
 0x2ab   : > { %795 = vrot.lane.b32.xlu0 %v787_v30, %s1630_s5  ;;  %v810_v22 = vmul.f32 %v787_v30, %v787_v30 }
 0x2ac   : > { %793 = vrot.lane.b32.xlu1 %v786_v31, %s1630_s5  ;;  %v809_v33 = vmul.f32 %v786_v31, %v786_v31 }
 0x2af   : > { %814 = vrot.lane.b32.xlu0 %v808_v32, %s1630_s5 }
 0x2b0   : > { %816 = vrot.lane.b32.xlu1 %v809_v33, %s1630_s5 }
 0x2b3   : > { %818 = vrot.lane.b32.xlu0 %v810_v22, %s1630_s5 }
 0x2b4   : > { %1138 = vrot.lane.b32.xlu1 %v1130_v34, %s1630_s5 }
 0x2b7   : > { %1136 = vrot.lane.b32.xlu0 %v2040_v58, %s1630_s5  ;;  %v2087_v58 = vrot.slane %v831_v54, %v1915_v43 }
 0x2b9   : > { %vm2317_vm14 = vcmp.ne.s32.totalorder %v2087_v58, 0  ;;  %vm840_vm5 = vcmp.eq.s32.totalorder %v2087_v58, 1 }
 0x2ba   : > { %v846_v35 = vpop.permute.xlu0 %845  ;;  %vm881_vm0 = vmand %vm667_vm3, %vm2317_vm14  ;;  %vm670_vm14 = vcmp.lt.s32.totalorder %v2112_v3, 240 }
 0x2bb   : > { %v883_v62 = vsel %vm881_vm0, 1, %v1625_v0  ;;  %vm2122_vm0 = vcmp.eq.s32.totalorder %v892_v2, 1  ;;  %vm973_vm15 = vmand %vm670_vm14, %vm758_vm8  ;;  %vm995_vm8 = vcmask 785408  }
 0x2bc   : > { %v888_v51 = vrot.slane %v883_v62, %v1915_v43  ;;  %v975_v23 = vsel %vm973_vm15, 1, %v1625_v0  ;;  %vm1081_vm15 = vcmask 769024  }
 0x2bd   : > { %v983_v30 = vrot.slane %v975_v23, %v1915_v43 }
 0x2be   : > { %v848_v36 = vpop.permute.xlu0 %847  ;;  %vm2118_vm13 = vcmp.eq.s32.totalorder %v888_v51, 1 }
 0x2bf   : > { %v852_v8 = vsel %vm851_vm1, %v846_v35, %v848_v36  ;;  %vm2163_vm4 = vcmp.eq.s32.totalorder %v983_v30, 1 }
 0x2c0   : > { %v856_v16 = vsel %vm840_vm5, %v852_v8, 0.0 }
 0x2c2   : > { %v850_v37 = vpop.permute.xlu0 %849 }
 0x2c3   : > { %v853_v9 = vsel %vm851_vm1, %v848_v36, %v850_v37 }
 0x2c4   : > { %v857_v17 = vsel %vm841_vm12, %v853_v9, 0.0 }
 0x2c6   : > { %v865_v38 = vpop.permute.xlu0 %864 }
 0x2ca   : > { %v867_v39 = vpop.permute.xlu0 %866 }
 0x2cb   : > { %v903_v44 = vpop.permute.xlu1 %902  ;;  %v870_v12 = vsel %vm797_vm6, %v865_v38, %v867_v39 }
 0x2cc   : > { %v874_v20 = vadd.f32 %v870_v12, %v856_v16 }
 0x2ce   : > { %v869_v40 = vpop.permute.xlu0 %868 }
 0x2cf   : > { %v2074_v48 = vpop.permute.xlu1 %993  ;;  %v871_v13 = vsel %vm797_vm6, %v867_v39, %v869_v40 }
 0x2d0   : > { %v875_v21 = vadd.f32 %v871_v13, %v857_v17 }
 0x2d2   : > { %v899_v47 = vpop.permute.xlu0 %898 }
 0x2d3   : > { %v920_v52 = vpop.permute.xlu1 %919 }
 0x2d6   : > { %v901_v49 = vpop.permute.xlu0 %900 }
 0x2d7   : > { %v2082_v56 = vpop.permute.xlu1 %1075  ;;  %v905_v10 = vsel %vm904_vm2, %v899_v47, %v901_v49  ;;  %v906_v11 = vsel %vm904_vm2, %v901_v49, %v903_v44 }
 0x2d8   : > { %v909_v18 = vsel %vm2118_vm13, %v905_v10, 0.0  ;;  %v910_v19 = vsel %vm2122_vm0, %v906_v11, 0.0 }
 0x2d9   : > { %v911_v25 = vadd.f32 %v909_v18, %v874_v20  ;;  %v912_v26 = vadd.f32 %v910_v19, %v875_v21 }
 0x2da   : > { %v2076_v50 = vpop.permute.xlu0 %958 }
 0x2db   : > { %v2096_v41 = vpop.permute.xlu1 %1079 }
 0x2de   : > { %v2079_v53 = vpop.permute.xlu0 %960 }
 0x2df   : > { %v2107_v1 = vpop.permute.xlu1 %1098 }
 0x2e2   : > { %v2084_v57 = vpop.permute.xlu0 %989 }
 0x2e3   : > { %v1011_v5 = vpop.permute.xlu1 %1010 }
 0x2e6   : > { %v2090_v59 = vpop.permute.xlu0 %991 }
 0x2e7   : > { %v1015_v28 = vpop.permute.xlu1 %1014  ;;  %v997_v37 = vsel %vm995_vm8, %v2090_v59, %v2074_v48  ;;  %v996_v44 = vsel %vm995_vm8, %v2084_v57, %v2090_v59 }
 0x2e8   : > { %v1001_v47 = vsel %vm2163_vm4, %v997_v37, 0.0 }
 0x2ea   : > { %v957_v61 = vpop.permute.xlu0 %956 }
 0x2eb   : > { %v1029_v38 = vpop.permute.xlu1 %1028 }
 0x2ee   : > { %v922_v42 = vpop.permute.xlu0 %921 }
 0x2ef   : > { %v925_v14 = vsel %vm735_vm7, %v920_v52, %v922_v42  ;;  %v1033_v57 = vpop.permute.xlu1 %1032 }
 0x2f0   : > { %v929_v24 = vsel %vm667_vm3, %v925_v14, 0.0  ;;  %vm962_vm3 = vcmask 777216  }
 0x2f1   : > { %v2154_v32 = vadd.f32 %v929_v24, %v911_v25  ;;  %v964_v40 = vsel %vm962_vm3, %v2076_v50, %v2079_v53  ;;  %v963_v49 = vsel %vm962_vm3, %v957_v61, %v2076_v50 }
 0x2f2   : > { %v2115_v4 = vpop.permute.xlu0 %1077  ;;  %v968_v54 = vsel %vm670_vm14, %v964_v40, 0.0 }
 0x2f3   : > { %v940_v39 = vmul.f32 %v2154_v32, %v2154_v32  ;;  %v1117_v14 = vpop.permute.xlu1 %1116  ;;  %v1082_v30 = vsel %vm1081_vm15, %v2082_v56, %v2115_v4 }
 0x2f6   : > { %v2136_v15 = vpop.permute.xlu0 %1096 }
 0x2f7   : > { %v1135_v17 = vpop.permute.xlu1 %1134 }
 0x2fa   : > { %v924_v29 = vpop.permute.xlu0 %923 }
 0x2fb   : > { %v926_v31 = vsel %vm735_vm7, %v922_v42, %v924_v29  ;;  %vm984_vm7 = vcmp.eq.s32.totalorder %v979_v45, 1  ;;  %v1003_v42 = vadd.f32 %v1001_v47, %v968_v54 }
 0x2fc   : > { %v2156_v33 = vadd.f32 %v926_v31, %v912_v26  ;;  %v1000_v62 = vsel %vm984_vm7, %v996_v44, 0.0  ;;  %v1083_v31 = vsel %vm1081_vm15, %v2115_v4, %v2096_v41 }
 0x2fd   : > { %v1002_v51 = vadd.f32 %v1000_v62, %v963_v49 }
 0x2fe   : > { %v1013_v22 = vpop.permute.xlu0 %1012  ;;  %v936_v34 = vadd.f32 %v2156_v33, %v2154_v32  ;;  %v941_v35 = vmul.f32 %v2156_v33, %v2156_v33 }
 0x2ff   : > { %v1016_v63 = vsel %vm797_vm6, %v1011_v5, %v1013_v22  ;;  %v1017_v53 = vsel %vm797_vm6, %v1013_v22, %v1015_v28 }
 0x300   : > { %937 = vadd.xlane.f32.xlu0 %v936_v34  ;;  %v942_v52 = vadd.f32 %v941_v35, %v940_v39  ;;  %v1020_v2 = vadd.f32 %v1016_v63, %v1002_v51  ;;  %v1021_v6 = vadd.f32 %v1017_v53, %v1003_v42 }
 0x302   : > { %v1095_v48 = vpop.permute.xlu0 %1094 }
 0x303   : > { %v1100_v35 = vsel %vm962_vm3, %v1095_v48, %v2136_v15 }
 0x304   : > { %943 = vadd.xlane.f32.xlu0 %v942_v52 }
 0x306   : > { %v1031_v59 = vpop.permute.xlu0 %1030 }
 0x307   : > { %v1034_v7 = vsel %vm699_vm9, %v1029_v38, %v1031_v59  ;;  %v1035_v50 = vsel %vm699_vm9, %v1031_v59, %v1033_v57  ;;  %vm2335_vm9 = vcmp.ne.s32.totalorder %v2094_v60, 0 }
 0x308   : > { %v1038_v61 = vsel %vm688_vm10, %v1034_v7, 0.0  ;;  %v1039_v8 = vsel %vm689_vm11, %v1035_v50, 0.0  ;;  %vm1059_vm10 = vmand %vm670_vm14, %vm2335_vm9  ;;  %vm2336_vm11 = vcmp.ne.s32.totalorder %v2087_v58, 0 }
 0x309   : > { %v2190_v9 = vadd.f32 %v1038_v61, %v1020_v2  ;;  %v2192_v10 = vadd.f32 %v1039_v8, %v1021_v6  ;;  %v1060_v18 = vsel %vm2336_vm11, 1, %v1625_v0  ;;  %v1061_v19 = vsel %vm1059_vm10, 1, %v1625_v0 }
 0x30a   : > { %v1115_v46 = vpop.permute.xlu0 %1114  ;;  %v1065_v21 = vrot.slane %v1060_v18, %v1915_v43  ;;  %v1069_v23 = vrot.slane %v1061_v19, %v1915_v43  ;;  %v1101_v0 = vsel %vm962_vm3, %v2136_v15, %v2107_v1 }
 0x30b   : > { %v1045_v11 = vadd.f32 %v2192_v10, %v2190_v9  ;;  %v1049_v5 = vmul.f32 %v2190_v9, %v2190_v9  ;;  %v1050_v12 = vmul.f32 %v2192_v10, %v2192_v10  ;;  %v1120_v45 = vsel %vm851_vm1, %v1115_v46, %v1117_v14 }
 0x30c   : > { %vm2221_vm2 = vcmp.eq.s32.totalorder %v1065_v21, 1  ;;  %vm2225_vm13 = vcmp.eq.s32.totalorder %v1069_v23, 1  ;;  %v1105_v34 = vsel %vm670_vm14, %v1101_v0, 0.0  ;;  %v1124_v41 = vsel %vm840_vm5, %v1120_v45, 0.0 }
 0x30d   : > { %1046 = vadd.xlane.f32.xlu0 %v1045_v11  ;;  %v1051_v13 = vadd.f32 %v1050_v12, %v1049_v5  ;;  %v1086_v36 = vsel %vm2221_vm2, %v1082_v30, 0.0  ;;  %v1087_v56 = vsel %vm2225_vm13, %v1083_v31, 0.0 }
 0x30e   : > { %v1119_v55 = vpop.permute.xlu0 %1118  ;;  %v1107_v39 = vadd.f32 %v1105_v34, %v1087_v56  ;;  %v1106_v40 = vadd.f32 %v1100_v35, %v1086_v36 }
 0x30f   : > { %1052 = vadd.xlane.f32.xlu1 %v1051_v13  ;;  %v1121_v1 = vsel %vm851_vm1, %v1117_v14, %v1119_v55 }
 0x310   : > { %v1125_v4 = vsel %vm841_vm12, %v1121_v1, 0.0  ;;  %v1126_v44 = vadd.f32 %v1124_v41, %v1106_v40 }
 0x311   : > { %v1127_v47 = vadd.f32 %v1125_v4, %v1107_v39 }
 0x319   : > { %v792_v16 = vpop.permute.xlu0 %791 }
 0x31d   : > { %v796_v20 = vpop.permute.xlu0 %795 }
 0x31e   : > { %v794_v24 = vpop.permute.xlu1 %793 }
 0x31f   : > { %v2211_v25 = vsel %vm797_vm6, %v792_v16, %v794_v24  ;;  %v2214_v26 = vsel %vm797_vm6, %v794_v24, %v796_v20 }
 0x320   : > { %v804_v27 = vadd.f32 %v2214_v26, %v2211_v25 }
 0x321   : > { %v815_v28 = vpop.permute.xlu0 %814 }
 0x322   : > { %805 = vadd.xlane.f32.xlu1 %v804_v27  ;;  %v817_v22 = vpop.permute.xlu1 %816 }
 0x323   : > { %v820_v38 = vsel %vm797_vm6, %v815_v28, %v817_v22 }
 0x325   : > { %v819_v37 = vpop.permute.xlu0 %818 }
 0x326   : > { %v821_v3 = vsel %vm797_vm6, %v817_v22, %v819_v37  ;;  %v1139_v49 = vpop.permute.xlu1 %1138 }
 0x327   : > { %v824_v15 = vadd.f32 %v821_v3, %v820_v38 }
 0x329   : > { %825 = vadd.xlane.f32.xlu1 %v824_v15  ;;  %v1137_v48 = vpop.permute.xlu0 %1136 }
 0x32a   : > { %v1140_v52 = vsel %vm797_vm6, %v1135_v17, %v1137_v48  ;;  %v1141_v58 = vsel %vm797_vm6, %v1137_v48, %v1139_v49 }
 0x32b   : > { %v1144_v54 = vadd.f32 %v1140_v52, %v1126_v44  ;;  %v1145_v62 = vadd.f32 %v1141_v58, %v1127_v47 }
 0x32d   : > { %v1149_v60 = vadd.f32 %v1145_v62, %v1144_v54  ;;  %v1153_v63 = vmul.f32 %v1144_v54, %v1144_v54  ;;  %v1154_v53 = vmul.f32 %v1145_v62, %v1145_v62 }
 0x32f   : > { %1150 = vadd.xlane.f32.xlu0 %v1149_v60  ;;  %v1155_v42 = vadd.f32 %v1154_v53, %v1153_v63 }
 0x331   : > { %1156 = vadd.xlane.f32.xlu1 %v1155_v42 }
 0x389   : > { %v938_v51 = vpop.xlane.xlu0 %937 }
 0x38d   : > { %v944_v2 = vpop.xlane.xlu0 %943 }
 0x396   : > { %v1047_v50 = vpop.xlane.xlu0 %1046 }
 0x398   : > { %v1053_v57 = vpop.xlane.xlu1 %1052 }
 0x3ab   : > { %v806_v59 = vpop.xlane.xlu1 %805 }
 0x3ac   : > { %v939_v7 = vadd.f32 %v938_v51, %v806_v59 }
 0x3ae   : > { %v1048_v8 = vadd.f32 %v1047_v50, %v939_v7 }
 0x3b2   : > { %v826_v6 = vpop.xlane.xlu1 %825 }
 0x3b3   : > { %v945_v61 = vadd.f32 %v944_v2, %v826_v6 }
 0x3b5   : > { %v1054_v12 = vadd.f32 %v1053_v57, %v945_v61 }
 0x3b8   : > { %v1151_v11 = vpop.xlane.xlu0 %1150 }
 0x3b9   : > { %v1152_v5 = vadd.f32 %v1151_v11, %v1048_v8 }
 0x3ba   : > { %v1157_v13 = vpop.xlane.xlu1 %1156 }
 0x3bb   : > { %v1160_v46 = vmul.f32 0.0009765625, %v1152_v5  ;;  %v1158_v14 = vadd.f32 %v1157_v13, %v1054_v12 }
 0x3bd   : > { %v1161_v55 = vmul.f32 0.0009765625, %v1158_v14  ;;  %v1162_v16 = vmul.f32 %v1160_v46, %v1160_v46  ;;  %v1169_v20 = vsub.f32 %v2211_v25, %v1160_v46  ;;  %v1170_v21 = vsub.f32 %v2214_v26, %v1160_v46 }
 0x3be   : > { %v1179_v23 = vsub.f32 %v2154_v32, %v1160_v46  ;;  %v1180_v24 = vsub.f32 %v2156_v33, %v1160_v46  ;;  %v1189_v0 = vsub.f32 %v2190_v9, %v1160_v46  ;;  %v1190_v28 = vsub.f32 %v2192_v10, %v1160_v46 }
 0x3bf   : > { %v1163_v17 = vsub.f32 %v1161_v55, %v1162_v16  ;;  %v1199_v29 = vsub.f32 %v1144_v54, %v1160_v46  ;;  %v1200_v43 = vsub.f32 %v1145_v62, %v1160_v46 }
 0x3c1   : > { %v1164_v18 = vmax.f32 %v1163_v17, 0.0 }
 0x3c3   : > { %v1165_v19 = vadd.f32 1e-05, %v1164_v18 }
 0x3c5   : > { %1477 = vrsqrt.f32 %v1165_v19 }
 0x3d2   : > { %v1478_v27 = vpop.eup %1477 }
 0x3d3   : > { %v1171_v30 = vmul.f32 %v1478_v27, %v1169_v20  ;;  %v1172_v31 = vmul.f32 %v1478_v27, %v1170_v21  ;;  %v1181_v45 = vmul.f32 %v1478_v27, %v1179_v23  ;;  %v1182_v25 = vmul.f32 %v1478_v27, %v1180_v24 }
 0x3d4   : > { %v1191_v1 = vmul.f32 %v1478_v27, %v1189_v0  ;;  %v1192_v26 = vmul.f32 %v1478_v27, %v1190_v28  ;;  %v1201_v22 = vmul.f32 %v1478_v27, %v1199_v29  ;;  %v1202_v32 = vmul.f32 %v1478_v27, %v1200_v43 }
 0x3d5   : > { %v1173_v34 = vmax.f32 %v1171_v30, 0.0  ;;  %v1174_v33 = vmax.f32 %v1172_v31, 0.0  ;;  %v1183_v35 = vmax.f32 %v1181_v45, 0.0  ;;  %v1184_v9 = vmax.f32 %v1182_v25, 0.0 }
 0x3d6   : > { %v1193_v10 = vmax.f32 %v1191_v1, 0.0  ;;  %v1194_v36 = vmax.f32 %v1192_v26, 0.0  ;;  %v1203_v56 = vmax.f32 %v1201_v22, 0.0  ;;  %v1204_v37 = vmax.f32 %v1202_v32, 0.0 }
 0x3d7   : > { %1175 = vst [vmem:[%s225_s26] sm:$0xff] %v1173_v34  ;;  %1176 = vst [vmem:[%s225_s26 + $0x8] sm:$0xff] %v1174_v33 }
 0x3d8   : > { %1347 = vst [vmem:[%s225_s26 + $0x10] sm:$0xff] %v1183_v35  ;;  %1348 = vst [vmem:[%s225_s26 + $0x18] sm:$0xff] %v1184_v9 }
 0x3d9   : > { %1351 = vst [vmem:[%s225_s26 + $0x20] sm:$0xff] %v1193_v10  ;;  %1352 = vst [vmem:[%s225_s26 + $0x28] sm:$0xff] %v1194_v36 }
 0x3da   : > { %1355 = vst [vmem:[%s225_s26 + $0x30] sm:$0xff] %v1203_v56  ;;  %1356 = vst [vmem:[%s225_s26 + $0x38] sm:$0xff] %v1204_v37 }
 0x3db   : > { %1546 = shalt.err (!%p1543_p5)
}
 0x3dc   : > { %s1547_s5 = scalar_lea.hbm %s2262_s22, 1024  ;;  %s1551_s10 = scalar_lea.hbm %s2315_s3, 2048 }
 0x3dd   : > { %p1548_p7 = scmp.ne.s32.totalorder %s2262_s22, %s1547_s5  ;;  %p1552_p9 = scmp.lt.s32.totalorder %s2262_s22, %s2315_s3 }
 0x3de   : > { %p1553_p11 = scmp.lt.s32.totalorder %s1551_s10, %s1547_s5 }
 0x3df   : > { %p1549_p6 = pnand %p1548_p7, %p1745_p13 }
 0x3e0   : > { %p1554_p12 = por %p1553_p11, %p1552_p9 }
 0x3e1   : > { %p1550_p4 = pneg %p1549_p6 }
 0x3e3   : > { %p1555_p1 = pnand %p1554_p12, %p1550_p4 }
 0x3e5   : > { %1558 = shalt.err (!%p1555_p1)
}
 0x3e6   : > { %s1636_s18 = smov 256   ;;  %s1637_s26 = smov 16  }
 0x3e7   : > { %1386 = dma.vmem_to_hbm [thread:$0]  (%p1745_p13), %s2264_s27, 1024, %s2262_s22, %s1208_s15, %s1636_s18, %s1636_s18, %s1637_s26  }
 0x3e8 PF: > { %s1238_s30 = sand.u32 1, %s1597_s12   ;;  %p2341_p8 = scmp.ne.s32.totalorder %s2322_s23, 0 }
 0x3e9   : > { %p2342_p10 = scmp.ge.s32.totalorder %s1617_s17, 2  ;;  %s1239_s20 = scalar_lea.sflag [#allocation5], %s1238_s30 }
 0x3eb   : > { %p1397_p0 = pnand %p2342_p10, %p2341_p8 }
 0x3ed   : > { %p1398_p2 = pneg %p1397_p0 }
 0x3ef   : > { %1592 = dma.done.wait (%p1398_p2), %s1239_s20, 1024  }
 0x3f0   : > { %1594 = vsyncadd (%p1398_p2), %s1239_s20, 4294966272  ;;  %s20_s17 = sadd.s32 1, %s1617_s17   ;;  %s2343_s12 = smov %s1601_s13 }
 0x3f1   : > { %p17_p3 = scmp.ge.s32.totalorder %s20_s17, 4   ;;  %s2344_s13 = smov %s1605_s14 }
 0x3f2   : > { %s2345_s14 = smov %s1754_s19  ;;  %s2346_s15 = smov %s1613_s16 }
 0x3f3   : > { %s2347_s16 = smov %s2349_s28  ;;  %19 = sbr.rel (!%p17_p3) target bundleno = 7 (0x7), region = 85 }
 0x3f8   :  { %1244 = vsyncpa [#allocation4], 1 }
 0x3f9   :  { %1246 = vsyncpa [#allocation4 + $0x1], 1 }
 0x3fa   :  { %1247 = vsyncpa [#allocation7], 1 }
 0x3fb   :  { %1248 = vsyncpa [#allocation5], 1 }
 0x3fc   :  { %1250 = vsyncpa [#allocation5 + $0x1], 1 }

</bundles_post_ra>
